<compile_context>
chip_gen: v6e
topology: v6e:2x2x1
jax: 0.10.0
libtpu: 0.0.40
codegen_flags: <defaults>
</compile_context>

<pallas_src>
import jax
import jax.numpy as jnp
from jax.experimental import pallas as pl
from jax.experimental.pallas import tpu as pltpu


def moe_expert_kernel(x_ref, dispT_ref, comb_ref, w1_ref, b1_ref, w2_ref,
                      b2_ref, out_ref, disp_scratch):
    """Grid = (token_tiles, experts, H_tiles).

    out_ref      : (tS, M) f32 accumulator, resident across (expert, H) axes.
    disp_scratch : (C, M) f32 dispatched tokens of the current expert,
                   computed once per (token tile, expert), reused per H tile.
    """
    e = pl.program_id(1)
    hk = pl.program_id(2)

    @pl.when(jnp.logical_and(e == 0, hk == 0))
    def _():
        out_ref[...] = jnp.zeros_like(out_ref)

    @pl.when(hk == 0)
    def _():
        # dispatch: (C, S)bf16 @ (S, M)bf16 -> (C, M)f32 on the MXU.
        # TODO(synk): replace this dense one-hot matmul with a scalar-prefetched
        # row gather of x (per-expert token indices in SMEM) to cut HBM traffic.
        disp_scratch[...] = jnp.dot(dispT_ref[...], x_ref[...],
                                    preferred_element_type=jnp.float32)
        # b2 contribution of this expert: combine @ (1_C ⊗ b2) == rowsum * b2,
        # added exactly once per (token tile, expert).
        comb_rowsum = jnp.sum(comb_ref[...].astype(jnp.float32), axis=-1,
                              keepdims=True)                       # (tS, 1)
        out_ref[...] += comb_rowsum * b2_ref[...]                  # (tS, M)

    # Expert FFN on one H chunk: relu(disp @ W1_k + b1_k) @ W2_k.
    # bf16 operands, f32 accumulation; bias+relu kept in f32 (cheap on VPU).
    h = jnp.dot(disp_scratch[...].astype(jnp.bfloat16), w1_ref[...],
                preferred_element_type=jnp.float32)                # (C, tH)
    h = jnp.maximum(h + b1_ref[...], 0.0)
    y = jnp.dot(h.astype(jnp.bfloat16), w2_ref[...],
                preferred_element_type=jnp.float32)                # (C, M)

    # combine: (tS, C)bf16 @ (C, M)bf16 -> (tS, M)f32, accumulated over (e, hk).
    out_ref[...] += jnp.dot(comb_ref[...], y.astype(jnp.bfloat16),
                            preferred_element_type=jnp.float32)


def moe_pallas(x, dispT, comb, w1, b1, w2, b2, *, t_s=None, t_h=None):
    """x:(S,M)bf16, dispT:(E,C,S)bf16, comb:(E,S,C)bf16,
    w1:(E,M,H)bf16, b1:(E,1,H)f32, w2:(E,H,M)bf16, b2:(E,1,M)f32."""
    S, M = x.shape
    E, C, _ = dispT.shape
    H = w1.shape[-1]
    t_s = t_s or S
    t_h = t_h or H
    assert S % t_s == 0 and H % t_h == 0

    grid = (S // t_s, E, H // t_h)

    return pl.pallas_call(
        moe_expert_kernel,
        out_shape=jax.ShapeDtypeStruct((S, M), jnp.float32),
        grid_spec=pltpu.PrefetchScalarGridSpec(
            num_scalar_prefetch=0,
            grid=grid,
            in_specs=[
                # x: shared by the dispatch matmul of every expert / token tile
                pl.BlockSpec((S, M), lambda st, e, hk: (0, 0)),
                # per-expert dispatch^T (C, S) — expert dim squeezed
                pl.BlockSpec((None, C, S), lambda st, e, hk: (e, 0, 0)),
                # per-expert combine weights, tiled over tokens (tS, C)
                pl.BlockSpec((None, t_s, C), lambda st, e, hk: (e, st, 0)),
                # per-expert FFN weights, tiled over the hidden dim H
                # (tunable: pipeline_mode=pl.Buffered(3) on these two streams)
                pl.BlockSpec((None, M, t_h), lambda st, e, hk: (e, 0, hk)),
                pl.BlockSpec((None, 1, t_h), lambda st, e, hk: (e, 0, hk)),
                pl.BlockSpec((None, t_h, M), lambda st, e, hk: (e, hk, 0)),
                pl.BlockSpec((None, 1, M), lambda st, e, hk: (e, 0, 0)),
            ],
            out_specs=pl.BlockSpec((t_s, M), lambda st, e, hk: (st, 0)),
            scratch_shapes=[pltpu.VMEM((C, M), jnp.float32)],
        ),
        compiler_params=pltpu.CompilerParams(
            # token tiles are independent (megacore on v7x); expert & H axes
            # accumulate into the resident output block.
            dimension_semantics=("parallel", "arbitrary", "arbitrary"),
            vmem_limit_bytes=48 * 1024 * 1024,
        ),
    )(x, dispT, comb, w1, b1, w2, b2)


def top1_gate(x, wg, num_experts, capacity):
    """Top-1 gating (ort_moe TopKGate, k=1). Returns dispatch/combine tensors."""
    logits = x @ wg                                     # (S, E)
    probs = jax.nn.softmax(logits, axis=-1)
    expert_idx = jnp.argmax(probs, axis=-1)             # (S,)
    gate_val = jnp.max(probs, axis=-1)                  # (S,)
    mask = jax.nn.one_hot(expert_idx, num_experts, dtype=jnp.float32)  # (S,E)
    # position of each token inside its expert's capacity buffer
    pos = (jnp.cumsum(mask, axis=0) - 1.0) * mask       # (S, E)
    keep = (pos < capacity).astype(jnp.float32) * mask  # drop overflow tokens
    pos_oh = jax.nn.one_hot(pos.astype(jnp.int32), capacity,
                            dtype=jnp.float32)          # (S, E, C)
    dispatch = keep[:, :, None] * pos_oh                # (S, E, C) 0/1
    combine = gate_val[:, None, None] * dispatch        # (S, E, C)
    return dispatch, combine


def moe_reference(x, dispatch, combine, w1_bf, b1, w2_bf, b2):
    """Pure-JAX reference (GShard einsum form) mirroring the kernel's
    bf16-operand / f32-accumulate numerics."""
    f32 = jnp.float32
    xd = x.astype(jnp.bfloat16).astype(f32)
    dm = dispatch.astype(jnp.bfloat16).astype(f32)
    cm = combine.astype(jnp.bfloat16).astype(f32)
    dispatched = jnp.einsum("sec,sm->ecm", dm, xd)
    h = jnp.einsum("ecm,emh->ech",
                   dispatched.astype(jnp.bfloat16).astype(f32),
                   w1_bf.astype(f32)) + b1[:, None, :]
    h = jnp.maximum(h, 0.0)
    y = jnp.einsum("ech,ehm->ecm",
                   h.astype(jnp.bfloat16).astype(f32),
                   w2_bf.astype(f32)) + b2[:, None, :]
    return jnp.einsum("sec,ecm->sm", cm, y.astype(jnp.bfloat16).astype(f32))


if __name__ == "__main__":
    # Small but lane/sublane-friendly shapes: batch=2, seq=64 -> S=128 tokens,
    # d_model=128, d_ff=256, num_experts=4, capacity=128 (== S, no drops).
    B, T, M, H, E = 2, 64, 128, 256, 4
    S = B * T
    C = 128
    T_S, T_H = 64, 128   # token tile (parallel axis), hidden tile

    key = jax.random.PRNGKey(0)
    kx, kg, k1, k2, kb1, kb2 = jax.random.split(key, 6)

    x_btm = jax.random.normal(kx, (B, T, M), dtype=jnp.float32)
    x = x_btm.reshape(S, M)

    # Gate: Linear(d_model, num_experts, bias=False)
    wg = jax.random.normal(kg, (M, E), dtype=jnp.float32) / jnp.sqrt(M)
    # Experts: FFNExpert = Linear(M, H) -> relu -> Linear(H, M), per expert
    w1 = jax.random.normal(k1, (E, M, H), dtype=jnp.float32) / jnp.sqrt(M)
    b1 = 0.01 * jax.random.normal(kb1, (E, H), dtype=jnp.float32)
    w2 = jax.random.normal(k2, (E, H, M), dtype=jnp.float32) / jnp.sqrt(H)
    b2 = 0.01 * jax.random.normal(kb2, (E, M), dtype=jnp.float32)

    # Gating / routing glue (plain JAX).
    dispatch, combine = top1_gate(x, wg, E, C)                    # (S,E,C) f32
    dispT = jnp.transpose(dispatch, (1, 2, 0)).astype(jnp.bfloat16)  # (E,C,S)
    comb = jnp.transpose(combine, (1, 0, 2)).astype(jnp.bfloat16)    # (E,S,C)

    # bf16 weights / activations in HBM; f32 accumulation inside the kernel.
    # TODO(synk): int8 (v5e/v6e) / fp8 (v7x) weight quantization, gated per chip.
    w1_bf = w1.astype(jnp.bfloat16)
    w2_bf = w2.astype(jnp.bfloat16)
    x_bf = x.astype(jnp.bfloat16)

    out = moe_pallas(x_bf, dispT, comb, w1_bf, b1.reshape(E, 1, H),
                     w2_bf, b2.reshape(E, 1, M), t_s=T_S, t_h=T_H)
    out = jax.block_until_ready(out)

    ref = moe_reference(x, dispatch, combine, w1_bf, b1, w2_bf, b2)
    assert out.shape == (S, M)
    max_err = float(jnp.max(jnp.abs(out - ref)))
    assert jnp.allclose(out, ref, atol=3e-2, rtol=3e-2), max_err

    # TODO(synk): expert_group_size > 1 path (all-to-all across expert ranks,
    # max-len padding/allreduce, fp16 cast before alltoall) needs remote DMA
    # and is single-device-elided here.
    print("KERNEL_OK")
</pallas_src>

<mosaic_0001>
module attributes {stable_mosaic.version = 11 : i64} {
  func.func @moe_expert_kernel(%arg0: i32, %arg1: i32, %arg2: i32, %arg3: memref<128x128xbf16, #tpu.memory_space<vmem>>, %arg4: memref<1x128x128xbf16, #tpu.memory_space<vmem>>, %arg5: memref<1x64x128xbf16, #tpu.memory_space<vmem>>, %arg6: memref<1x128x128xbf16, #tpu.memory_space<vmem>>, %arg7: memref<1x1x128xf32, #tpu.memory_space<vmem>>, %arg8: memref<1x128x128xbf16, #tpu.memory_space<vmem>>, %arg9: memref<1x1x128xf32, #tpu.memory_space<vmem>>, %arg10: memref<64x128xf32, #tpu.memory_space<vmem>>, %arg11: memref<128x128xf32, #tpu.memory_space<vmem>>) attributes {dimension_semantics = [#tpu.dimension_semantics<parallel>, #tpu.dimension_semantics<arbitrary>, #tpu.dimension_semantics<arbitrary>], iteration_bounds = array<i64: 2, 4, 2>, scalar_prefetch = 0 : i64, scratch_operands = 1 : i64, tpu.core_type = #tpu.core_type<tc>, window_params = [{pipeline_mode = #tpu.pipeline_mode<synchronous>, transform_indices = @transform_0, window_bounds = array<i64: 128, 128>}, {transform_indices = @transform_1, window_bounds = array<i64: 1, 128, 128>}, {transform_indices = @transform_2, window_bounds = array<i64: 1, 64, 128>}, {transform_indices = @transform_3, window_bounds = array<i64: 1, 128, 128>}, {transform_indices = @transform_4, window_bounds = array<i64: 1, 1, 128>}, {transform_indices = @transform_5, window_bounds = array<i64: 1, 128, 128>}, {transform_indices = @transform_6, window_bounds = array<i64: 1, 1, 128>}, {transform_indices = @transform_7, window_bounds = array<i64: 64, 128>}]} {
    %c0_i32 = arith.constant 0 : i32
    %0 = arith.cmpi eq, %arg1, %c0_i32 : i32
    %c0_i32_0 = arith.constant 0 : i32
    %1 = arith.cmpi eq, %arg2, %c0_i32_0 : i32
    %2 = arith.andi %0, %1 : i1
    %3 = arith.extui %2 : i1 to i32
    %c0_i32_1 = arith.constant 0 : i32
    %4 = arith.cmpi ne, %3, %c0_i32_1 : i32
    scf.if %4 {
      %cst_24 = arith.constant 0.000000e+00 : f32
      %30 = vector.broadcast %cst_24 : f32 to vector<64x128xf32>
      %c0_25 = arith.constant 0 : index
      %c0_26 = arith.constant 0 : index
      %31 = vector.load %arg10[%c0_25, %c0_26] : memref<64x128xf32, #tpu.memory_space<vmem>>, vector<64x128xf32>
      tpu.vector_store %arg10[%c0_25, %c0_26], %30 {strides = array<i32>} : memref<64x128xf32, #tpu.memory_space<vmem>>, vector<64x128xf32>,
    } else {
    }
    %c0_i32_2 = arith.constant 0 : i32
    %5 = arith.cmpi eq, %arg2, %c0_i32_2 : i32
    %6 = arith.extui %5 : i1 to i32
    %c0_i32_3 = arith.constant 0 : i32
    %7 = arith.cmpi ne, %6, %c0_i32_3 : i32
    scf.if %7 {
      %c0_24 = arith.constant 0 : index
      %c0_25 = arith.constant 0 : index
      %c0_26 = arith.constant 0 : index
      %30 = vector.load %arg4[%c0_24, %c0_25, %c0_26] : memref<1x128x128xbf16, #tpu.memory_space<vmem>>, vector<1x128x128xbf16>
      %31 = vector.shape_cast %30 : vector<1x128x128xbf16> to vector<128x128xbf16>
      %c0_27 = arith.constant 0 : index
      %c0_28 = arith.constant 0 : index
      %32 = vector.load %arg3[%c0_27, %c0_28] : memref<128x128xbf16, #tpu.memory_space<vmem>>, vector<128x128xbf16>
      %cst_29 = arith.constant dense<0.000000e+00> : vector<128x128xf32>
      %33 = tpu.matmul %31, %32, %cst_29 {dimension_numbers = #tpu.dot_dimension_numbers<[1], [0], [0], [1], [0, 0, 1, 1], [], []>} : vector<128x128xbf16>, vector<128x128xbf16>, vector<128x128xf32> -> vector<128x128xf32>
      %c0_30 = arith.constant 0 : index
      %c0_31 = arith.constant 0 : index
      %34 = vector.load %arg11[%c0_30, %c0_31] : memref<128x128xf32, #tpu.memory_space<vmem>>, vector<128x128xf32>
      tpu.vector_store %arg11[%c0_30, %c0_31], %33 {strides = array<i32>} : memref<128x128xf32, #tpu.memory_space<vmem>>, vector<128x128xf32>,
      %c0_32 = arith.constant 0 : index
      %c0_33 = arith.constant 0 : index
      %c0_34 = arith.constant 0 : index
      %35 = vector.load %arg5[%c0_32, %c0_33, %c0_34] : memref<1x64x128xbf16, #tpu.memory_space<vmem>>, vector<1x64x128xbf16>
      %36 = vector.shape_cast %35 : vector<1x64x128xbf16> to vector<64x128xbf16>
      %37 = arith.extf %36 : vector<64x128xbf16> to vector<64x128xf32>
      %cst_35 = arith.constant dense<0.000000e+00> : vector<64xf32>
      %38 = vector.multi_reduction <add>, %37, %cst_35 [1] : vector<64x128xf32> to vector<64xf32>
      %39 = vector.shape_cast %38 : vector<64xf32> to vector<64x1xf32>
      %c0_36 = arith.constant 0 : index
      %c0_37 = arith.constant 0 : index
      %40 = vector.load %arg10[%c0_36, %c0_37] : memref<64x128xf32, #tpu.memory_space<vmem>>, vector<64x128xf32>
      %c0_38 = arith.constant 0 : index
      %c0_39 = arith.constant 0 : index
      %c0_40 = arith.constant 0 : index
      %41 = vector.load %arg9[%c0_38, %c0_39, %c0_40] : memref<1x1x128xf32, #tpu.memory_space<vmem>>, vector<1x1x128xf32>
      %42 = vector.shape_cast %41 : vector<1x1x128xf32> to vector<1x128xf32>
      %43 = vector.broadcast %39 : vector<64x1xf32> to vector<64x128xf32>
      %44 = vector.broadcast %42 : vector<1x128xf32> to vector<64x128xf32>
      %45 = arith.mulf %43, %44 : vector<64x128xf32>
      %46 = arith.addf %40, %45 : vector<64x128xf32>
      %c0_41 = arith.constant 0 : index
      %c0_42 = arith.constant 0 : index
      %47 = vector.load %arg10[%c0_41, %c0_42] : memref<64x128xf32, #tpu.memory_space<vmem>>, vector<64x128xf32>
      tpu.vector_store %arg10[%c0_41, %c0_42], %46 {strides = array<i32>} : memref<64x128xf32, #tpu.memory_space<vmem>>, vector<64x128xf32>,
    } else {
    }
    %c0 = arith.constant 0 : index
    %c0_4 = arith.constant 0 : index
    %8 = vector.load %arg11[%c0, %c0_4] : memref<128x128xf32, #tpu.memory_space<vmem>>, vector<128x128xf32>
    %9 = arith.truncf %8 : vector<128x128xf32> to vector<128x128xbf16>
    %c0_5 = arith.constant 0 : index
    %c0_6 = arith.constant 0 : index
    %c0_7 = arith.constant 0 : index
    %10 = vector.load %arg6[%c0_5, %c0_6, %c0_7] : memref<1x128x128xbf16, #tpu.memory_space<vmem>>, vector<1x128x128xbf16>
    %11 = vector.shape_cast %10 : vector<1x128x128xbf16> to vector<128x128xbf16>
    %cst = arith.constant dense<0.000000e+00> : vector<128x128xf32>
    %12 = tpu.matmul %9, %11, %cst {dimension_numbers = #tpu.dot_dimension_numbers<[1], [0], [0], [1], [0, 0, 1, 1], [], []>} : vector<128x128xbf16>, vector<128x128xbf16>, vector<128x128xf32> -> vector<128x128xf32>
    %c0_8 = arith.constant 0 : index
    %c0_9 = arith.constant 0 : index
    %c0_10 = arith.constant 0 : index
    %13 = vector.load %arg7[%c0_8, %c0_9, %c0_10] : memref<1x1x128xf32, #tpu.memory_space<vmem>>, vector<1x1x128xf32>
    %14 = vector.shape_cast %13 : vector<1x1x128xf32> to vector<1x128xf32>
    %15 = vector.broadcast %14 : vector<1x128xf32> to vector<128x128xf32>
    %16 = arith.addf %12, %15 : vector<128x128xf32>
    %cst_11 = arith.constant 0.000000e+00 : f32
    %17 = vector.broadcast %cst_11 : f32 to vector<128x128xf32>
    %18 = arith.maximumf %16, %17 : vector<128x128xf32>
    %19 = arith.truncf %18 : vector<128x128xf32> to vector<128x128xbf16>
    %c0_12 = arith.constant 0 : index
    %c0_13 = arith.constant 0 : index
    %c0_14 = arith.constant 0 : index
    %20 = vector.load %arg8[%c0_12, %c0_13, %c0_14] : memref<1x128x128xbf16, #tpu.memory_space<vmem>>, vector<1x128x128xbf16>
    %21 = vector.shape_cast %20 : vector<1x128x128xbf16> to vector<128x128xbf16>
    %cst_15 = arith.constant dense<0.000000e+00> : vector<128x128xf32>
    %22 = tpu.matmul %19, %21, %cst_15 {dimension_numbers = #tpu.dot_dimension_numbers<[1], [0], [0], [1], [0, 0, 1, 1], [], []>} : vector<128x128xbf16>, vector<128x128xbf16>, vector<128x128xf32> -> vector<128x128xf32>
    %c0_16 = arith.constant 0 : index
    %c0_17 = arith.constant 0 : index
    %23 = vector.load %arg10[%c0_16, %c0_17] : memref<64x128xf32, #tpu.memory_space<vmem>>, vector<64x128xf32>
    %c0_18 = arith.constant 0 : index
    %c0_19 = arith.constant 0 : index
    %c0_20 = arith.constant 0 : index
    %24 = vector.load %arg5[%c0_18, %c0_19, %c0_20] : memref<1x64x128xbf16, #tpu.memory_space<vmem>>, vector<1x64x128xbf16>
    %25 = vector.shape_cast %24 : vector<1x64x128xbf16> to vector<64x128xbf16>
    %26 = arith.truncf %22 : vector<128x128xf32> to vector<128x128xbf16>
    %cst_21 = arith.constant dense<0.000000e+00> : vector<64x128xf32>
    %27 = tpu.matmul %25, %26, %cst_21 {dimension_numbers = #tpu.dot_dimension_numbers<[1], [0], [0], [1], [0, 0, 1, 1], [], []>} : vector<64x128xbf16>, vector<128x128xbf16>, vector<64x128xf32> -> vector<64x128xf32>
    %28 = arith.addf %23, %27 : vector<64x128xf32>
    %c0_22 = arith.constant 0 : index
    %c0_23 = arith.constant 0 : index
    %29 = vector.load %arg10[%c0_22, %c0_23] : memref<64x128xf32, #tpu.memory_space<vmem>>, vector<64x128xf32>
    tpu.vector_store %arg10[%c0_22, %c0_23], %28 {strides = array<i32>} : memref<64x128xf32, #tpu.memory_space<vmem>>, vector<64x128xf32>,
    return
  }
  func.func @transform_0(%arg0: i32, %arg1: i32, %arg2: i32) -> (i32, i32) {
    %c0_i32 = arith.constant 0 : i32
    %c0_i32_0 = arith.constant 0 : i32
    %c0_i32_1 = arith.constant 0 : i32
    return %c0_i32, %c0_i32_0 : i32, i32
  }
  func.func @transform_1(%arg0: i32, %arg1: i32, %arg2: i32) -> (i32, i32, i32) {
    %c0_i32 = arith.constant 0 : i32
    %c0_i32_0 = arith.constant 0 : i32
    %c0_i32_1 = arith.constant 0 : i32
    return %arg1, %c0_i32, %c0_i32_0 : i32, i32, i32
  }
  func.func @transform_2(%arg0: i32, %arg1: i32, %arg2: i32) -> (i32, i32, i32) {
    %c0_i32 = arith.constant 0 : i32
    %c0_i32_0 = arith.constant 0 : i32
    return %arg1, %arg0, %c0_i32 : i32, i32, i32
  }
  func.func @transform_3(%arg0: i32, %arg1: i32, %arg2: i32) -> (i32, i32, i32) {
    %c0_i32 = arith.constant 0 : i32
    %c0_i32_0 = arith.constant 0 : i32
    return %arg1, %c0_i32, %arg2 : i32, i32, i32
  }
  func.func @transform_4(%arg0: i32, %arg1: i32, %arg2: i32) -> (i32, i32, i32) {
    %c0_i32 = arith.constant 0 : i32
    %c0_i32_0 = arith.constant 0 : i32
    return %arg1, %c0_i32, %arg2 : i32, i32, i32
  }
  func.func @transform_5(%arg0: i32, %arg1: i32, %arg2: i32) -> (i32, i32, i32) {
    %c0_i32 = arith.constant 0 : i32
    %c0_i32_0 = arith.constant 0 : i32
    return %arg1, %arg2, %c0_i32 : i32, i32, i32
  }
  func.func @transform_6(%arg0: i32, %arg1: i32, %arg2: i32) -> (i32, i32, i32) {
    %c0_i32 = arith.constant 0 : i32
    %c0_i32_0 = arith.constant 0 : i32
    %c0_i32_1 = arith.constant 0 : i32
    return %arg1, %c0_i32, %c0_i32_0 : i32, i32, i32
  }
  func.func @transform_7(%arg0: i32, %arg1: i32, %arg2: i32) -> (i32, i32) {
    %c0_i32 = arith.constant 0 : i32
    %c0_i32_0 = arith.constant 0 : i32
    return %arg0, %c0_i32 : i32, i32
  }
}

</mosaic_0001>

<bundles_post_ra>
// kernel: tpu_custom_call.1
= control target key start
LH: loop header
LB: loop body
LE: loop exit
PB: predicated region body
PF: predicated region fallthrough
CT: control target
= control target key end

     0   :  { %s3106_s0 = inlined_call_operand.hbm [shape: bf16[128,128], index: 0, kind: input, shape index: {}]   ;;  %s3107_s1 = inlined_call_operand.hbm [shape: bf16[4,128,128], index: 1, kind: input, shape index: {}]   ;;  %s3108_s2 = inlined_call_operand.hbm [shape: bf16[4,128,128], index: 2, kind: input, shape index: {}]   ;;  %s3109_s3 = inlined_call_operand.hbm [shape: bf16[4,128,256], index: 3, kind: input, shape index: {}]   ;;  %s3110_s4 = inlined_call_operand.hbm [shape: f32[4,1,256], index: 4, kind: input, shape index: {}]   ;;  %s3111_s5 = inlined_call_operand.hbm [shape: bf16[4,256,128], index: 5, kind: input, shape index: {}]   ;;  %s3112_s6 = inlined_call_operand.vmem [shape: f32[4,1,128], index: 6, kind: input, shape index: {}]   ;;  %s3113_s7 = inlined_call_operand.hbm [shape: f32[128,128], index: 7, kind: output, shape index: {}]  }
   0x1   :  { %3154 = sst [smem:[#allocation45_spill]] %s3106_s0 }
   0x2   :  { %3155 = sst [smem:[#allocation46_spill]] %s3107_s1 }
   0x3   :  { %3156 = sst [smem:[#allocation47_spill]] %s3108_s2 }
   0x4   :  { %3157 = sst [smem:[#allocation48_spill]] %s3109_s3 }
   0x5   :  { %3158 = sst [smem:[#allocation49_spill]] %s3110_s4 }
   0x6   :  { %3159 = sst [smem:[#allocation50_spill]] %s3111_s5 }
   0x7   :  { %3160 = sst [smem:[#allocation51_spill]] %s3112_s6 }
   0x8   :  { %3161 = sst [smem:[#allocation52_spill]] %s3113_s7 }
   0x9   :  { %12 = vsyncpa [#allocation4], 0 }
   0xa   :  { %13 = vsyncpa [#allocation7], 0 }
   0xb   :  { %15 = vsyncpa [#allocation7 + $0x1], 0 }
   0xc   :  { %16 = vsyncpa [#allocation10], 0 }
   0xd   :  { %18 = vsyncpa [#allocation10 + $0x1], 0 }
   0xe   :  { %19 = vsyncpa [#allocation13], 0 }
   0xf   :  { %21 = vsyncpa [#allocation13 + $0x1], 0 }
  0x10   :  { %22 = vsyncpa [#allocation5], 0 }
  0x11   :  { %24 = vsyncpa [#allocation5 + $0x1], 0  ;;  %s2530_s24 = smov 0   ;;  %s2532_s25 = smov 0  }
  0x12   :  { %s2534_s26 = smov 0   ;;  %s2536_s27 = smov 0  }
  0x13   :  { %s2538_s28 = smov 0   ;;  %s2540_s29 = smov 0  }
  0x14   :  { %s2542_s30 = smov 0   ;;  %s2544_s8 = smov 0  }
  0x15   :  { %s2546_s9 = smov 0   ;;  %s2548_s10 = smov 0  }
  0x16   :  { %s2550_s11 = smov 0   ;;  %s2552_s12 = smov 0  }
  0x17   :  { %s2554_s13 = smov 0   ;;  %s2556_s14 = smov 0  }
  0x18   :  { %s2558_s15 = smov 0   ;;  %s2560_s16 = smov 0  }
  0x19   :  { %s2562_s17 = smov 0   ;;  %s2564_s18 = smov 0  }
  0x1a   :  { %s2566_s19 = smov 0  }
  0x1b LB: > { %3162 = sst [smem:[#allocation21_spill]] %s2403_s24  ;;  %s42_s20 = sadd.s32 1, %s2463_s16  ;;  %s2475_s19 = sphi %s2566_s19, %s30_s19   ;;  %s2471_s18 = sphi %s2564_s18, %s3269_s18   ;;  %s2467_s17 = sphi %s2562_s17, %s3268_s17   ;;  %s2463_s16 = sphi %s2560_s16, %s3267_s16   ;;  %s2459_s15 = sphi %s2558_s15, %s3266_s15   ;;  %s2455_s14 = sphi %s2556_s14, %s3265_s14   ;;  %s2451_s13 = sphi %s2554_s13, %s3264_s13   ;;  %s2447_s12 = sphi %s2552_s12, %s3263_s12   ;;  %s2443_s11 = sphi %s2550_s11, %s3253_s11   ;;  %s2439_s10 = sphi %s2548_s10, %s3252_s10   ;;  %s2435_s9 = sphi %s2546_s9, %s3262_s9   ;;  %s2431_s8 = sphi %s2544_s8, %s3261_s8   ;;  %s2427_s30 = sphi %s2542_s30, %s3251_s30   ;;  %s2423_s29 = sphi %s2540_s29, %s3260_s29   ;;  %s2419_s28 = sphi %s2538_s28, %s3249_s28   ;;  %s2415_s27 = sphi %s2536_s27, %s3248_s27   ;;  %s2411_s26 = sphi %s2534_s26, %s3259_s26   ;;  %s2407_s25 = sphi %s2532_s25, %s3257_s25   ;;  %s2403_s24 = sphi %s2530_s24, %s3246_s24  }
  0x1c   : > { %3163 = sst [smem:[#allocation22_spill]] %s2407_s25  ;;  %s45_s21 = sadd.s32 1, %s2467_s17 }
  0x1d   : > { %3164 = sst [smem:[#allocation23_spill]] %s2419_s28  ;;  %p43_p0 = scmp.ge.s32.totalorder %s42_s20, 2 }
  0x1e   : > { %3165 = sst [smem:[#allocation24_spill]] %s2423_s29  ;;  %s77_s22 = sadd.s32 1, %s2447_s12 }
  0x1f   : > { %3166 = sst [smem:[#allocation25_spill]] %s2427_s30  ;;  %p84_p1 = scmp.ne.s32.totalorder %s2447_s12, %s2443_s11 }
  0x20   : > { %3167 = sst [smem:[#allocation26_spill]] %s2431_s8  ;;  %p3128_p2 = scmp.eq.s32.totalorder %s2475_s19, 0 }
  0x21   : > { %3168 = sst [smem:[#allocation27_spill]] %s2443_s11  ;;  %s3271_s20 = smov (%p43_p0, %s42_s20), 0 }
  0x22   : > { %3169 = sst [smem:[#allocation28_spill]] %s2447_s12  ;;  %s3273_s21 = smov (!%p43_p0, %s45_s21), %s2467_s17 }
  0x23   : > { %3170 = sst [smem:[#allocation29_spill]] %s2451_s13  ;;  %p2638_p3 = por %p3128_p2, %p84_p1 }
  0x24   : > { %3171 = sst [smem:[#allocation30_spill]] %s2455_s14  ;;  %p90_p4 = scmp.ne.s32.totalorder %s2443_s11, %s2439_s10 }
  0x25   : > { %3172 = sst [smem:[#allocation31_spill]] %s2459_s15  ;;  %p3129_p5 = scmp.ge.s32.totalorder %s3273_s21, 4 }
  0x26   : > { %3173 = sst [smem:[#allocation32_spill]] %s3271_s20  ;;  %s129_s7 = ssub.s32 %s2463_s16, %s3271_s20 }
  0x27   : > { %3174 = sst [smem:[#allocation33_spill]] %s3273_s21  ;;  %p3127_p6 = scmp.lt.s32.totalorder %s2475_s19, 16 }
  0x28   : > { %s2650_s15 = scalar_select %p3129_p5, 0, %s3273_s21  }
  0x29   : > { %s293_s4 = sand.u32 1, %s2447_s12   ;;  %s1637_s20 = sshll.u32 %s2467_s17, 10 }
  0x2a   : > { %3176 = sst [smem:[#allocation34_spill]] %s2650_s15  ;;  %s2655_s6 = ssub.s32 %s2467_s17, %s2650_s15 }
  0x2b   : > { %3177 = sst [smem:[#allocation35_spill]] %s2655_s6  ;;  %p75_p7 = scmp.eq.s32.totalorder %s2655_s6, 0 }
  0x2c   : > { %s2660_s14 = sor.u32 %s129_s7, %s2655_s6  ;;  %s1570_s2 = sshll.u32 %s293_s4, 6 }
  0x2d   : > { %p131_p8 = scmp.eq.s32.totalorder %s2660_s14, 0  ;;  %s3179_s1 = sld [smem:[#allocation46_spill]] }
  0x2e   : > { %s2664_s5 = scalar_select %p75_p7, %s2447_s12, %s77_s22  }
  0x2f   : > { %p2675_p9 = pnand %p3127_p6, %p2638_p3  ;;  %s295_s7 = scalar_lea.vmem [#allocation6], %s1570_s2 }
  0x30   : > { %3178 = sst [smem:[#allocation36_spill]] %s2664_s5  ;;  %s302_s13 = sshll.u32 %s295_s7, 4  ;;  %s303_s13 = int_to_ptr.vmem [resolvable:$true] %s302_s13 }
  0x31   : > { %s3181_s6 = sand.u32 1, %s2475_s19   ;;  %p2111_p10 = pneg %p2675_p9 }
  0x32   : > { %s2681_s22 = scalar_lea.sflag [#allocation7], %s3181_s6  ;;  %s2122_s4 = scalar_lea.vmem %s303_s13, 1024 }
  0x33   : > { %s301_s21 = scalar_lea.hbm %s3179_s1, %s1637_s20  ;;  %p2123_p11 = scmp.ne.s32.totalorder %s303_s13, %s2122_s4 }
  0x34   : > { %s2477_s30 = smov [#allocation6]  }
  0x35   : > { %p2125_p12 = pnand %p2123_p11, %p2111_p10  ;;  %s2127_s8 = sshll.u32 %s2477_s30, 4  ;;  %s2128_s8 = int_to_ptr.vmem [resolvable:$false] %s2127_s8 }
  0x36   : > { %s2129_s20 = scalar_lea.vmem %s2128_s8, 2048  ;;  %p2130_p0 = scmp.lt.s32.totalorder %s303_s13, %s2128_s8 }
  0x37   : > { %p2126_p13 = pneg %p2125_p12  ;;  %p2131_p1 = scmp.lt.s32.totalorder %s2129_s20, %s2122_s4 }
  0x39   : > { %p2132_p3 = por %p2131_p1, %p2130_p0 }
  0x3b   : > { %p2133_p7 = pnand %p2132_p3, %p2126_p13 }
  0x3d   : > { %2136 = shalt.err (!%p2133_p7)
}
  0x3e   : > { %s3121_s2 = smov 64   ;;  %s3123_s6 = smov 4  }
  0x3f   : > { %1893 = dma.hbm_to_vmem [thread:$0]  (!%p2675_p9), %s301_s21, 1024, %s303_s13, %s2681_s22, %s3121_s2, %s3121_s2, %s3123_s6  }
  0x40   : > { %s133_s23 = sadd.s32 1, %s2423_s29  ;;  %p140_p10 = scmp.ne.s32.totalorder %s2423_s29, %s2419_s28 }
  0x41   : > { %s2697_s7 = scalar_select %p131_p8, %s2423_s29, %s133_s23  }
  0x42   : > { %p142_p11 = por %p140_p10, %p3128_p2  ;;  %s2702_s4 = sand.u32 1, %s2423_s29  }
  0x43   : > { %3182 = sst [smem:[#allocation37_spill]] %s2697_s7  ;;  %s3130_s30 = sshll.u32 %s2702_s4, 6 }
  0x44   : > { %s3125_s8 = sshll.u32 %s2467_s17, 5  ;;  %s339_s1 = scalar_lea.vmem [#allocation9], %s3130_s30 }
  0x45   : > { %s344_s15 = sadd.s32 %s2463_s16, %s3125_s8  ;;  %s347_s5 = sshll.u32 %s339_s1, 4  ;;  %s348_s5 = int_to_ptr.vmem [resolvable:$true] %s347_s5 }
  0x46   : > { %s1579_s20 = sshll.u32 %s344_s15, 6  ;;  %s3183_s3 = sld [smem:[#allocation48_spill]] }
  0x47   : > { %p2716_p8 = pnand %p3127_p6, %p142_p11  ;;  %s3185_s2 = sand.u32 1, %s2475_s19  }
  0x48   : > { %s2722_s6 = scalar_lea.sflag [#allocation10], %s3185_s2  ;;  %s2150_s15 = scalar_lea.vmem %s348_s5, 1024 }
  0x49   : > { %3186 = sst [smem:[#allocation38_spill]] %s2722_s6  ;;  %p3126_p9 = pneg %p2716_p8 }
  0x4a   : > { %p2151_p12 = scmp.ne.s32.totalorder %s348_s5, %s2150_s15  ;;  %s2480_s1 = smov [#allocation9]  }
  0x4c   : > { %s346_s14 = scalar_lea.hbm %s3183_s3, %s1579_s20  ;;  %p2153_p13 = pnand %p2151_p12, %p3126_p9 }
  0x4d   : > { %s2155_s20 = sshll.u32 %s2480_s1, 4  ;;  %s2156_s20 = int_to_ptr.vmem [resolvable:$false] %s2155_s20 }
  0x4e   : > { %p2154_p0 = pneg %p2153_p13  ;;  %s2157_s13 = scalar_lea.vmem %s2156_s20, 2048 }
  0x4f   : > { %p2158_p1 = scmp.lt.s32.totalorder %s348_s5, %s2156_s20  ;;  %p2159_p3 = scmp.lt.s32.totalorder %s2157_s13, %s2150_s15 }
  0x51   : > { %p2160_p7 = por %p2159_p3, %p2158_p1 }
  0x53   : > { %p2161_p10 = pnand %p2160_p7, %p2154_p0 }
  0x55   : > { %2164 = shalt.err (!%p2161_p10)
}
  0x56   : > { %s2481_s21 = smov 128   ;;  %s3187_s2 = smov 4  }
  0x57   : > { %s3188_s8 = smov 64   ;;  %s2735_s15 = sadd.s32 4294967295, %s2475_s19  }
  0x58   : > { %1899 = dma.hbm_to_vmem [thread:$0]  (!%p2716_p8), %s346_s14, 1024, %s348_s5, %s2722_s6, %s2481_s21, %s3188_s8, %s3187_s2  }
  0x59   : > { %3189 = sst [smem:[#allocation39_spill]] %s2735_s15  ;;  %s1566_s1 = sadd.s32 4294967294, %s2475_s19  }
  0x5a   : > { %p91_p11 = scmp.eq.s32.totalorder %s2735_s15, 0  ;;  %p146_p12 = scmp.ne.s32.totalorder %s2419_s28, %s2415_s27 }
  0x5b   : > { %p251_p0 = scmp.ne.s32.totalorder %s2411_s26, %s2407_s25  ;;  %p252_p3 = scmp.eq.s32.totalorder %s2735_s15, 15 }
  0x5c   : > { %p2747_p13 = por %p91_p11, %p90_p4  ;;  %p2755_p1 = por %p146_p12, %p91_p11 }
  0x5d   : > { %p257_p7 = scmp.ne.s32.totalorder %s2407_s25, %s2403_s24  ;;  %p258_p10 = scmp.eq.s32.totalorder %s1566_s1, 15 }
  0x5e   : > { %s3190_s13 = scalar_select %p2747_p13, 1, 0 }
  0x5f   : > { %s3192_s5 = scalar_select %p2755_p1, 1, 0 }
  0x60   : > { %3191 = sst [smem:[#allocation40_spill]] %s3190_s13  ;;  %p2762_p9 = por %p252_p3, %p251_p0 }
  0x61   : > { %3193 = sst [smem:[#allocation41_spill]] %s3192_s5  ;;  %p1567_p6 = scmp.ge.s32.totalorder %s2475_s19, 1 }
  0x62   : > { %s3194_s14 = scalar_select %p2762_p9, 1, 0 }
  0x63   : > { %p2767_p2 = por %p258_p10, %p257_p7  ;;  %p265_p4 = scmp.lt.s32.totalorder %s2475_s19, 17 }
  0x64   : > { %3195 = sst [smem:[#allocation42_spill]] %s3194_s14  ;;  %s2482_s21 = smov [#allocation3]  }
  0x65   : > { %s3196_s27 = scalar_select %p2767_p2, 1, 0 }
  0x66   : > { %p2772_p5 = pnand %p1567_p6, %p265_p4  ;;  %s277_s30 = sshll.u32 %s2482_s21, 4  ;;  %s278_s30 = int_to_ptr.vmem [resolvable:$true] %s277_s30 }
  0x67   : > { %3197 = sst [smem:[#allocation43_spill]] %s3196_s27  ;;  %s2176_s1 = scalar_lea.vmem %s278_s30, 1024 }
  0x68   : > { %s3198_s10 = scalar_select %p2772_p5, 1, 0 }
  0x69   : > { %p1886_p12 = pneg %p2772_p5  ;;  %p2177_p9 = scmp.ne.s32.totalorder %s278_s30, %s2176_s1 }
  0x6a   : > { %3199 = sst [smem:[#allocation44_spill]] %s3198_s10  ;;  %p2184_p1 = scmp.lt.s32.totalorder %s278_s30, %s278_s30 }
  0x6b   : > { %p1887_p0 = pnand %p1886_p12, %p91_p11  ;;  %p2185_p2 = scmp.lt.s32.totalorder %s2176_s1, %s2176_s1 }
  0x6d   : > { %p2167_p3 = pneg %p1887_p0  ;;  %p2186_p13 = por %p2185_p2, %p2184_p1 }
  0x6f   : > { %p2179_p7 = pnand %p2177_p9, %p2167_p3 }
  0x71   : > { %p2180_p10 = pneg %p2179_p7 }
  0x73   : > { %p2187_p6 = pnand %p2186_p13, %p2180_p10 }
  0x75   : > { %2190 = shalt.err (!%p2187_p6)
}
  0x76   : > { %s3200_s0 = sld [smem:[#allocation45_spill]]  ;;  %s49_s29 = sadd.s32 1, %s2471_s18 }
  0x77   : > { %s3201_s3 = sld [smem:[#allocation33_spill]]  ;;  %s105_s27 = sadd.s32 1, %s2435_s9 }
  0x78   : > { %s3202_s12 = sld [smem:[#allocation26_spill]]  ;;  %s314_s20 = sand.u32 1, %s2435_s9  }
  0x79   : > { %s3203_s7 = sld [smem:[#allocation25_spill]]  ;;  %p3206_p4 = scmp.eq.s32.totalorder %s2475_s19, 0 }
  0x7a   : > { %s3204_s1 = sld [smem:[#allocation35_spill]]  ;;  %s1575_s24 = sshll.u32 %s2467_s17, 4 }
  0x7b   : > { %s3210_s14 = sadd.s32 1, %s2411_s26  ;;  %s3211_s10 = sld [smem:[#allocation47_spill]] }
  0x7c   : > { %1889 = dma.hbm_to_vmem [thread:$0]  (!%p1887_p0), %s3200_s0, 1024, %s278_s30, [#allocation4], %s3188_s8, %s3188_s8, %s3187_s2  }
  0x7d   : > { %p3205_p2 = scmp.ge.s32.totalorder %s3201_s3, 4  ;;  %s1573_s3 = sshll.u32 %s314_s20, 5 }
  0x7e   : > { %p112_p9 = scmp.ne.s32.totalorder %s2435_s9, %s3202_s12  ;;  %p3212_p10 = scmp.lt.s32.totalorder %s2475_s19, 16 }
  0x7f   : > { %s3275_s29 = smov (!%p3205_p2, %s49_s29), %s2471_s18  ;;  %p118_p13 = scmp.ne.s32.totalorder %s3202_s12, %s3203_s7 }
  0x80   : > { %p51_p1 = scmp.ge.s32.totalorder %s3275_s29, 2  ;;  %p2798_p12 = por %p112_p9, %p3206_p4 }
  0x81   : > { %p2804_p3 = por %p118_p13, %p91_p11  ;;  %s1574_s12 = sshll.u32 %s2471_s18, 3 }
  0x82   : > { %s3277_s29 = smov (%p51_p1, %s3275_s29), 0  ;;  %s322_s28 = sadd.s32 %s1575_s24, %s1574_s12 }
  0x83   : > { %s3208_s30 = scalar_select %p2804_p3, 1, 0 }
  0x84   : > { %s101_s7 = ssub.s32 %s2471_s18, %s3277_s29  ;;  %s1576_s11 = sshll.u32 %s322_s28, 6 }
  0x85   : > { %3209 = sst [smem:[#allocation33_spill]] %s3208_s30  ;;  %s102_s0 = sor.u32 %s101_s7, %s3204_s1 }
  0x86   : > { %p239_p0 = scmp.eq.s32.totalorder %s101_s7, 0  ;;  %p103_p7 = scmp.eq.s32.totalorder %s102_s0, 0 }
  0x87   : > { %s316_s30 = scalar_lea.vmem [#allocation8], %s1573_s3  ;;  %s324_s6 = scalar_lea.hbm %s3211_s10, %s1576_s11 }
  0x88   : > { %s2818_s25 = scalar_select %p239_p0, %s2411_s26, %s3210_s14  }
  0x89   : > { %s2821_s5 = scalar_select %p103_p7, %s2435_s9, %s105_s27  }
  0x8a   : > { %s325_s13 = sshll.u32 %s316_s30, 4  ;;  %p2830_p6 = pnand %p3212_p10, %p2798_p12  ;;  %s326_s13 = int_to_ptr.vmem [resolvable:$true] %s325_s13 }
  0x8b   : > { %s1580_s0 = sshll.u32 %s2467_s17, 1  ;;  %s2204_s24 = scalar_lea.vmem %s326_s13, 512 }
  0x8c   : > { %s365_s14 = sadd.s32 %s2463_s16, %s1580_s0  ;;  %p2193_p2 = pneg %p2830_p6 }
  0x8d   : > { %p2205_p9 = scmp.ne.s32.totalorder %s326_s13, %s2204_s24  ;;  %s2483_s28 = smov [#allocation8]  }
  0x8e   : > { %s2209_s27 = sshll.u32 %s2483_s28, 4  ;;  %s2210_s27 = int_to_ptr.vmem [resolvable:$false] %s2209_s27 }
  0x8f   : > { %p2207_p13 = pnand %p2205_p9, %p2193_p2  ;;  %s2211_s15 = scalar_lea.vmem %s2210_s27, 1024 }
  0x90   : > { %p2212_p4 = scmp.lt.s32.totalorder %s326_s13, %s2210_s27  ;;  %p2213_p0 = scmp.lt.s32.totalorder %s2211_s15, %s2204_s24 }
  0x91   : > { %p2208_p1 = pneg %p2207_p13 }
  0x92   : > { %p2214_p7 = por %p2213_p0, %p2212_p4 }
  0x94   : > { %p2215_p12 = pnand %p2214_p7, %p2208_p1 }
  0x96   : > { %2218 = shalt.err (!%p2215_p12)
}
  0x97   : > { %1896 = dma.hbm_to_vmem [thread:$0]  (!%p2830_p6), %s324_s6, 512, %s326_s13, %s2681_s22, %s3188_s8, %s3188_s8, %s3187_s2  }
  0x98   : > { %s1581_s11 = sshll.u32 %s365_s14, 4  ;;  %s360_s10 = scalar_lea.vmem [#allocation11], %s2702_s4 }
  0x99   : > { %s369_s21 = sshll.u32 %s360_s10, 4  ;;  %s3214_s12 = sld [smem:[#allocation49_spill]]  ;;  %s370_s21 = int_to_ptr.vmem [resolvable:$true] %s369_s21 }
  0x9a   : > { %s2232_s20 = scalar_lea.vmem %s370_s21, 16  ;;  %p3215_p2 = pneg %p2716_p8 }
  0x9b   : > { %p2233_p10 = scmp.ne.s32.totalorder %s370_s21, %s2232_s20  ;;  %s2484_s1 = smov [#allocation11]  }
  0x9c   : > { %s2237_s0 = sshll.u32 %s2484_s1, 4  ;;  %s2238_s0 = int_to_ptr.vmem [resolvable:$false] %s2237_s0 }
  0x9d   : > { %p2235_p9 = pnand %p2233_p10, %p3215_p2  ;;  %s2239_s24 = scalar_lea.vmem %s2238_s0, 32 }
  0x9e   : > { %p2240_p1 = scmp.lt.s32.totalorder %s370_s21, %s2238_s0  ;;  %p2241_p6 = scmp.lt.s32.totalorder %s2239_s24, %s2232_s20 }
  0x9f   : > { %s367_s7 = scalar_lea.hbm %s3214_s12, %s1581_s11  ;;  %p2236_p13 = pneg %p2235_p9 }
  0xa0   : > { %p2242_p4 = por %p2241_p6, %p2240_p1 }
  0xa2   : > { %p2243_p0 = pnand %p2242_p4, %p2236_p13 }
  0xa4   : > { %2246 = shalt.err (!%p2243_p0)
}
  0xa5   : > { %s3216_s22 = sld [smem:[#allocation38_spill]]  ;;  %s1583_s6 = sshll.u32 %s2463_s16, 4 }
  0xa6   : > { %s3217_s13 = sshll.u32 %s2702_s4, 6  ;;  %s3218_s27 = sshll.u32 %s2467_s17, 5 }
  0xa7   : > { %s380_s14 = scalar_lea.vmem [#allocation12], %s3217_s13  ;;  %s386_s15 = sadd.s32 %s1583_s6, %s3218_s27 }
  0xa8   : > { %s389_s28 = sshll.u32 %s380_s14, 4  ;;  %s1585_s11 = sshll.u32 %s386_s15, 6  ;;  %s390_s28 = int_to_ptr.vmem [resolvable:$true] %s389_s28 }
  0xa9   : > { %s3219_s3 = sld [smem:[#allocation50_spill]]  ;;  %s377_s20 = scalar_lea.sflag [#allocation13], %s2702_s4 }
  0xaa   : > { %s2260_s1 = scalar_lea.vmem %s390_s28, 1024  ;;  %p3220_p12 = pmov %p3215_p2 }
  0xab   : > { %1902 = dma.hbm_to_vmem [thread:$0]  (!%p2716_p8), %s367_s7, 16, %s370_s21, %s3216_s22  }
  0xac   : > { %p2261_p7 = scmp.ne.s32.totalorder %s390_s28, %s2260_s1  ;;  %s2485_s21 = smov [#allocation12]  }
  0xad   : > { %s2265_s7 = sshll.u32 %s2485_s21, 4  ;;  %s2266_s7 = int_to_ptr.vmem [resolvable:$false] %s2265_s7 }
  0xae   : > { %p2263_p10 = pnand %p2261_p7, %p3220_p12  ;;  %s2267_s0 = scalar_lea.vmem %s2266_s7, 2048 }
  0xaf   : > { %s388_s12 = scalar_lea.hbm %s3219_s3, %s1585_s11  ;;  %p2268_p9 = scmp.lt.s32.totalorder %s390_s28, %s2266_s7 }
  0xb0   : > { %p2264_p2 = pneg %p2263_p10  ;;  %p2269_p13 = scmp.lt.s32.totalorder %s2267_s0, %s2260_s1 }
  0xb2   : > { %p2270_p1 = por %p2269_p13, %p2268_p9 }
  0xb4   : > { %p2271_p6 = pnand %p2270_p1, %p2264_p2 }
  0xb6   : > { %2274 = shalt.err (!%p2271_p6)
}
  0xb7   : > { %1905 = dma.hbm_to_vmem [thread:$0]  (!%p2716_p8), %s388_s12, 1024, %s390_s28, %s377_s20, %s3188_s8, %s3188_s8, %s3187_s2  }
  0xb8   : > { %407 = sbr.rel (%p2772_p5) target bundleno = 1208 (0x4b8), region = 48  ;;  %s3222_s24 = sld [smem:[#allocation39_spill]] (!%p2772_p5) }
  0xbd   : > { %2378 = dma.done.wait (%p91_p11), [#allocation4], 1024  }
  0xbe   : > { %2380 = vsyncadd (%p91_p11), [#allocation4], 4294966272  ;;  %s3223_s22 = sld [smem:[#allocation27_spill]]  ;;  %s413_s13 = sand.u32 1, %s3222_s24  }
  0xbf   : > { %s3224_s6 = sld [smem:[#allocation40_spill]]  ;;  %s414_s23 = scalar_lea.sflag [#allocation7], %s413_s13 }
  0xc4   : > { %s415_s14 = sand.u32 1, %s3223_s22  }
  0xc5   : > { %s1588_s27 = sshll.u32 %s415_s14, 6  ;;  %p3225_p4 = scmp.ne.s32.totalorder %s3224_s6, 0 }
  0xc6   : > { %s2879_s15 = scalar_lea.vmem [#allocation6], %s1588_s27 }
  0xc7   : > { %2382 = dma.done.wait (%p3225_p4), %s414_s23, 1024  }
  0xc8   : > { %2384 = vsyncadd (%p3225_p4), %s414_s23, 4294966272  ;;  %s3226_s8 = sld [smem:[#allocation26_spill]] }
  0xce   : > { %s424_s28 = sand.u32 1, %s3226_s8  }
  0xcf   : > { %s1589_s11 = sshll.u32 %s424_s28, 5 }
  0xd0   : > { %s2886_s10 = scalar_lea.vmem [#allocation8], %s1589_s11 }
  0xd1   : > { %2386 = dma.done.wait (%p2804_p3), %s414_s23, 512  }
  0xd2   : > { %2388 = vsyncadd (%p2804_p3), %s414_s23, 4294966784  ;;  %s3228_s30 = sld [smem:[#allocation23_spill]]  ;;  %s432_s1 = scalar_lea.sflag [#allocation10], %s413_s13 }
  0xd3   : > { %s3229_s3 = sld [smem:[#allocation41_spill]] }
  0xd8   : > { %s2893_s12 = sand.u32 1, %s3228_s30  }
  0xd9   : > { %s1590_s20 = sshll.u32 %s2893_s12, 6  ;;  %p3230_p5 = scmp.ne.s32.totalorder %s3229_s3, 0 }
  0xda   : > { %s2896_s21 = scalar_lea.vmem [#allocation9], %s1590_s20 }
  0xdb   : > { %2390 = dma.done.wait (%p3230_p5), %s432_s1, 1040  }
  0xdc   : > { %2392 = vsyncadd (%p3230_p5), %s432_s1, 4294966256  ;;  %s443_s7 = scalar_lea.vmem [#allocation11], %s2893_s12  ;;  %s449_s0 = scalar_lea.sflag [#allocation13], %s2893_s12 }
  0xdd   : > { %s2904_s4 = scalar_lea.vmem [#allocation12], %s1590_s20 }
  0xde   : > { %2394 = dma.done.wait (%p3230_p5), %s449_s0, 1024  }
  0xdf   : > { %2396 = vsyncadd (%p3230_p5), %s449_s0, 4294966272  ;;  %s3231_s24 = sld [smem:[#allocation22_spill]] }
  0xe0   : > { %s3232_s22 = sld [smem:[#allocation30_spill]] }
  0xe1   : > { %s3233_s6 = sld [smem:[#allocation29_spill]] }
  0xe2   : > { %s3234_s8 = sld [smem:[#allocation51_spill]] }
  0xe5   : > { %s502_s13 = sand.u32 1, %s3231_s24  }
  0xe6   : > { %p507_p8 = scmp.lt.s32.totalorder %s3232_s22, 3  ;;  %s1592_s14 = sshll.u32 %s502_s13, 6 }
  0xe7   : > { %p512_p11 = scmp.eq.s32.totalorder %s3232_s22, 0  ;;  %p513_p3 = scmp.eq.s32.totalorder %s3233_s6, 0 }
  0xe8   : > { %s3279_s22 = smov (!%p507_p8, %s3232_s22), 3  ;;  %s2923_s28 = scalar_lea.vmem [#allocation14], %s1592_s14 }
  0xe9   : > { %p514_p0 = pnand %p513_p3, %p512_p11  ;;  %s509_s2 = scalar_lea.vmem %s3234_s8, %s3279_s22 }
  0xeb   : > { %517 = sbr.rel (%p514_p0) target bundleno = 245 (0xf5), region = 76 }
  0xf0   : > { %v2486_v0 = vmov 0.0  }
  0xf1   : > { %518 = vst [vmem:[%s2923_s28] sm:$0xff] %v2486_v0  ;;  %519 = vst [vmem:[%s2923_s28 + $0x8] sm:$0xff] %v2486_v0 }
  0xf2   : > { %520 = vst [vmem:[%s2923_s28 + $0x10] sm:$0xff] %v2486_v0  ;;  %521 = vst [vmem:[%s2923_s28 + $0x18] sm:$0xff] %v2486_v0 }
  0xf3   : > { %522 = vst [vmem:[%s2923_s28 + $0x20] sm:$0xff] %v2486_v0  ;;  %523 = vst [vmem:[%s2923_s28 + $0x28] sm:$0xff] %v2486_v0 }
  0xf4   : > { %524 = vst [vmem:[%s2923_s28 + $0x30] sm:$0xff] %v2486_v0  ;;  %525 = vst [vmem:[%s2923_s28 + $0x38] sm:$0xff] %v2486_v0 }
  0xf5 PF: > { %s3235_s11 = sld [smem:[#allocation29_spill]] }
  0xfb   : > { %p1593_p7 = scmp.ne.s32.totalorder %s3235_s11, 0 }
  0xfd   : > { %528 = sbr.rel (%p1593_p7) target bundleno = 499 (0x1f3), region = 80 }
 0x102   : > { %v2073_v1 = vld [vmem:[#allocation3 + $0x38] sm:$0xff]   ;;  %v2074_v2 = vld [vmem:[#allocation3 + $0x30] sm:$0xff]   ;;  %v2075_v3 = vld [vmem:[#allocation3 + $0x28] sm:$0xff]  }
 0x103   : > { %1718 = vmatprep.subr.bf16.mxu0 %v2073_v1  ;;  %1838 = vmatprep.subr.bf16.mxu1 %v2073_v1  ;;  %v2076_v4 = vld [vmem:[#allocation3 + $0x20] sm:$0xff]   ;;  %v2077_v7 = vld [vmem:[#allocation3 + $0x18] sm:$0xff]   ;;  %v2078_v8 = vld [vmem:[#allocation3 + $0x10] sm:$0xff]  }
 0x104   : > { %1719 = vmatpush3.bf16.msra.mxu0 %v2073_v1  ;;  %1846 = vmatpush3.bf16.msra.mxu1 %v2073_v1  ;;  %v2081_v5 = vld [vmem:[%s2879_s15] sm:$0xff]   ;;  %v1655_v9 = vld [vmem:[%s2886_s10 + $0x8] sm:$0xff]   ;;  %v1656_v16 = vld [vmem:[%s2886_s10 + $0x10] sm:$0xff]  }
 0x105   : > { %1720 = vmatprep.subr.bf16.mxu0 %v2074_v2  ;;  %1839 = vmatprep.subr.bf16.mxu1 %v2074_v2  ;;  %v2082_v6 = vld [vmem:[%s2879_s15 + $0x20] sm:$0xff]   ;;  %v1645_v11 = vunpack.c.l.bf16 %v1655_v9  ;;  %v2079_v13 = vld [vmem:[#allocation3 + $0x8] sm:$0xff]   ;;  %v1646_v14 = vunpack.c.h.bf16 %v1655_v9  ;;  %v1650_v18 = vunpack.c.h.bf16 %v1656_v16  ;;  %v1649_v19 = vunpack.c.l.bf16 %v1656_v16  ;;  %v1657_v20 = vld [vmem:[%s2886_s10 + $0x18] sm:$0xff]  }
 0x106   : > { %1734 = vmatprep.mubr.bf16.mxu0 %v2081_v5  ;;  %1742 = vmatprep.mubr.bf16.mxu1 %v2082_v6  ;;  %v1640_v10 = vld [vmem:[%s2886_s10] sm:$0xff]   ;;  %v1654_v21 = vunpack.c.h.bf16 %v1657_v20  ;;  %v1653_v22 = vunpack.c.l.bf16 %v1657_v20  ;;  %v2083_v23 = vld [vmem:[%s2879_s15 + $0x8] sm:$0xff]   ;;  %v2085_v25 = vld [vmem:[%s2879_s15 + $0x10] sm:$0xff]  }
 0x107   : > { %v1641_v12 = vunpack.c.l.bf16 %v1640_v10  ;;  %790 = vadd.xlane.f32.xlu1 %v1645_v11  ;;  %v1642_v15 = vunpack.c.h.bf16 %v1640_v10  ;;  %v2080_v17 = vld [vmem:[#allocation3] sm:$0xff]   ;;  %v2084_v24 = vld [vmem:[%s2879_s15 + $0x28] sm:$0xff]   ;;  %v2086_v26 = vld [vmem:[%s2879_s15 + $0x30] sm:$0xff]  }
 0x108   : > { %1721 = vmatpush3.bf16.msra.mxu0 %v2074_v2  ;;  %1847 = vmatpush3.bf16.msra.mxu1 %v2074_v2  ;;  %v2087_v27 = vld [vmem:[%s2879_s15 + $0x18] sm:$0xff]   ;;  %v1610_v29 = vld [vmem:[%s509_s2] ss:$0 sm:$0xff]  ;;  %v802_v32 = vld [vmem:[%s2923_s28] sm:$0xff] }
 0x109   : > { %1722 = vmatprep.subr.bf16.mxu0 %v2075_v3  ;;  %1840 = vmatprep.subr.bf16.mxu1 %v2075_v3  ;;  %v2088_v28 = vld [vmem:[%s2879_s15 + $0x38] sm:$0xff]   ;;  %v803_v40 = vld [vmem:[%s2923_s28 + $0x8] sm:$0xff]  ;;  %v806_v48 = vld [vmem:[%s2923_s28 + $0x20] sm:$0xff] }
 0x10a   : > { %786 = vadd.xlane.f32.xlu0 %v1641_v12  ;;  %v804_v30 = vld [vmem:[%s2923_s28 + $0x10] sm:$0xff]  ;;  %v805_v38 = vld [vmem:[%s2923_s28 + $0x18] sm:$0xff]  ;;  %v807_v46 = vld [vmem:[%s2923_s28 + $0x28] sm:$0xff] }
 0x10b   : > { %792 = vadd.xlane.f32.xlu1 %v1646_v14  ;;  %v809_v54 = vld [vmem:[%s2923_s28 + $0x38] sm:$0xff]  ;;  %v808_v56 = vld [vmem:[%s2923_s28 + $0x30] sm:$0xff] }
 0x10c   : > { %1723 = vmatpush3.bf16.msra.mxu0 %v2075_v3  ;;  %1848 = vmatpush3.bf16.msra.mxu1 %v2075_v3 }
 0x10d   : > { %1724 = vmatprep.subr.bf16.mxu0 %v2076_v4  ;;  %1841 = vmatprep.subr.bf16.mxu1 %v2076_v4 }
 0x10e   : > { %788 = vadd.xlane.f32.xlu0 %v1642_v15 }
 0x10f   : > { %796 = vadd.xlane.f32.xlu1 %v1650_v18 }
 0x110   : > { %1725 = vmatpush3.bf16.msra.mxu0 %v2076_v4  ;;  %1849 = vmatpush3.bf16.msra.mxu1 %v2076_v4 }
 0x111   : > { %1726 = vmatprep.subr.bf16.mxu0 %v2077_v7  ;;  %1842 = vmatprep.subr.bf16.mxu1 %v2077_v7 }
 0x112   : > { %794 = vadd.xlane.f32.xlu0 %v1649_v19 }
 0x113   : > { %800 = vadd.xlane.f32.xlu1 %v1654_v21 }
 0x114   : > { %1727 = vmatpush3.bf16.msra.mxu0 %v2077_v7  ;;  %1850 = vmatpush3.bf16.msra.mxu1 %v2077_v7 }
 0x115   : > { %1728 = vmatprep.subr.bf16.mxu0 %v2078_v8  ;;  %1843 = vmatprep.subr.bf16.mxu1 %v2078_v8 }
 0x116   : > { %798 = vadd.xlane.f32.xlu0 %v1653_v22 }
 0x118   : > { %1729 = vmatpush3.bf16.msra.mxu0 %v2078_v8  ;;  %1851 = vmatpush3.bf16.msra.mxu1 %v2078_v8 }
 0x119   : > { %1730 = vmatprep.subr.bf16.mxu0 %v2079_v13  ;;  %1844 = vmatprep.subr.bf16.mxu1 %v2079_v13 }
 0x11c   : > { %1731 = vmatpush3.bf16.msra.mxu0 %v2079_v13  ;;  %1852 = vmatpush3.bf16.msra.mxu1 %v2079_v13 }
 0x11d   : > { %1732 = vmatprep.subr.bf16.mxu0 %v2080_v17  ;;  %1845 = vmatprep.subr.bf16.mxu1 %v2080_v17 }
 0x120   : > { %1733 = vmatpush3.bf16.msra.mxu0 %v2080_v17  ;;  %1853 = vmatpush3.bf16.msra.mxu1 %v2080_v17 }
 0x123   : > { %1735 = vmatmul.mubr.bf16.vlgmr.msra.gmra.mxu0 %v2083_v23  ;;  %1743 = vmatmul.mubr.bf16.vlgmr.msra.gmra.mxu1 %v2084_v24 }
 0x124   : > { %1738 = vmatprep.mubr.bf16.mxu0 %v2085_v25  ;;  %1746 = vmatprep.mubr.bf16.mxu1 %v2086_v26 }
 0x12b   : > { %1739 = vmatmul.mubr.bf16.gmra.mxu0 %v2087_v27  ;;  %1747 = vmatmul.mubr.bf16.gmra.mxu1 %v2088_v28 }
 0x190   : > { %v791_v31 = vpop.xlane.xlu1 %790 }
 0x191   : > { %v819_v34 = vmul.f32 %v1610_v29, %v791_v31 }
 0x193   : > { %v787_v33 = vpop.xlane.xlu0 %786  ;;  %v827_v36 = vadd.f32 %v819_v34, %v804_v30 }
 0x194   : > { %v817_v35 = vmul.f32 %v1610_v29, %v787_v33  ;;  %v793_v39 = vpop.xlane.xlu1 %792 }
 0x195   : > { %835 = vst [vmem:[%s2923_s28 + $0x10] sm:$0xff] %v827_v36  ;;  %v820_v42 = vmul.f32 %v1610_v29, %v793_v39 }
 0x196   : > { %v825_v37 = vadd.f32 %v817_v35, %v802_v32 }
 0x197   : > { %v789_v41 = vpop.xlane.xlu0 %788  ;;  %v828_v44 = vadd.f32 %v820_v42, %v805_v38 }
 0x198   : > { %833 = vst [vmem:[%s2923_s28] sm:$0xff] %v825_v37  ;;  %v818_v43 = vmul.f32 %v1610_v29, %v789_v41  ;;  %v797_v47 = vpop.xlane.xlu1 %796 }
 0x199   : > { %836 = vst [vmem:[%s2923_s28 + $0x18] sm:$0xff] %v828_v44  ;;  %v822_v50 = vmul.f32 %v1610_v29, %v797_v47 }
 0x19a   : > { %v826_v45 = vadd.f32 %v818_v43, %v803_v40 }
 0x19b   : > { %v795_v49 = vpop.xlane.xlu0 %794  ;;  %v830_v52 = vadd.f32 %v822_v50, %v807_v46 }
 0x19c   : > { %834 = vst [vmem:[%s2923_s28 + $0x8] sm:$0xff] %v826_v45  ;;  %v821_v51 = vmul.f32 %v1610_v29, %v795_v49  ;;  %v801_v55 = vpop.xlane.xlu1 %800 }
 0x19d   : > { %838 = vst [vmem:[%s2923_s28 + $0x28] sm:$0xff] %v830_v52  ;;  %v824_v58 = vmul.f32 %v1610_v29, %v801_v55 }
 0x19e   : > { %v829_v53 = vadd.f32 %v821_v51, %v806_v48 }
 0x19f   : > { %v799_v57 = vpop.xlane.xlu0 %798  ;;  %v832_v60 = vadd.f32 %v824_v58, %v809_v54 }
 0x1a0   : > { %837 = vst [vmem:[%s2923_s28 + $0x20] sm:$0xff] %v829_v53  ;;  %v823_v59 = vmul.f32 %v1610_v29, %v799_v57 }
 0x1a1   : > { %840 = vst [vmem:[%s2923_s28 + $0x38] sm:$0xff] %v832_v60 }
 0x1a2   : > { %v831_v61 = vadd.f32 %v823_v59, %v808_v56 }
 0x1a4   : > { %839 = vst [vmem:[%s2923_s28 + $0x30] sm:$0xff] %v831_v61 }
 0x1e3   : > { %v1736_v62 = vpop.f32.mrf.mxu0  ;;  %v1744_v63 = vpop.f32.mrf.mxu1 }
 0x1e4   : > { %756 = vst [vmem:[#allocation2 + $0x58] sm:$0xff] %v1736_v62  ;;  %764 = vst [vmem:[#allocation2 + $0x10] sm:$0xff] %v1744_v63 }
 0x1e5   : > { %v691_v0 = vpop.f32.mrf.mxu0  ;;  %v723_v1 = vpop.f32.mrf.mxu1 }
 0x1e6   : > { %754 = vst [vmem:[#allocation2 + $0x30] sm:$0xff] %v691_v0  ;;  %762 = vst [vmem:[#allocation2 + $0x40] sm:$0xff] %v723_v1 }
 0x1e7   : > { %v1737_v2 = vpop.f32.mrf.mxu0  ;;  %v1745_v3 = vpop.f32.mrf.mxu1 }
 0x1e8   : > { %757 = vst [vmem:[#allocation2 + $0x18] sm:$0xff] %v1737_v2  ;;  %765 = vst [vmem:[#allocation2 + $0x38] sm:$0xff] %v1745_v3 }
 0x1e9   : > { %v694_v4 = vpop.f32.mrf.mxu0  ;;  %v726_v5 = vpop.f32.mrf.mxu1 }
 0x1ea   : > { %755 = vst [vmem:[#allocation2] sm:$0xff] %v694_v4  ;;  %763 = vst [vmem:[#allocation2 + $0x20] sm:$0xff] %v726_v5 }
 0x1eb   : > { %v1740_v6 = vpop.f32.mrf.mxu0  ;;  %v1748_v7 = vpop.f32.mrf.mxu1 }
 0x1ec   : > { %760 = vst [vmem:[#allocation2 + $0x8] sm:$0xff] %v1740_v6  ;;  %768 = vst [vmem:[#allocation2 + $0x78] sm:$0xff] %v1748_v7 }
 0x1ed   : > { %v707_v8 = vpop.f32.mrf.mxu0  ;;  %v739_v9 = vpop.f32.mrf.mxu1 }
 0x1ee   : > { %758 = vst [vmem:[#allocation2 + $0x50] sm:$0xff] %v707_v8  ;;  %766 = vst [vmem:[#allocation2 + $0x60] sm:$0xff] %v739_v9 }
 0x1ef   : > { %v1741_v10 = vpop.f32.mrf.mxu0  ;;  %v1749_v11 = vpop.f32.mrf.mxu1 }
 0x1f0   : > { %761 = vst [vmem:[#allocation2 + $0x48] sm:$0xff] %v1741_v10  ;;  %769 = vst [vmem:[#allocation2 + $0x28] sm:$0xff] %v1749_v11 }
 0x1f1   : > { %v710_v12 = vpop.f32.mrf.mxu0  ;;  %v742_v13 = vpop.f32.mrf.mxu1 }
 0x1f2   : > { %759 = vst [vmem:[#allocation2 + $0x68] sm:$0xff] %v710_v12  ;;  %767 = vst [vmem:[#allocation2 + $0x70] sm:$0xff] %v742_v13 }
 0x1f3 PF: > { %v2089_v14 = vld [vmem:[%s2896_s21 + $0x38] sm:$0xff]   ;;  %v2090_v15 = vld [vmem:[%s2896_s21 + $0x30] sm:$0xff]   ;;  %v2091_v16 = vld [vmem:[%s2896_s21 + $0x28] sm:$0xff]   ;;  %s3237_s15 = sld [smem:[#allocation31_spill]]  ;;  %s1361_s12 = sshll.u32 %s2923_s28, 4  ;;  %s3008_s12 = int_to_ptr.vmem [resolvable:$true] %s1361_s12 }
 0x1f4   : > { %1750 = vmatprep.subr.bf16.mxu0 %v2089_v14  ;;  %v2092_v17 = vld [vmem:[%s2896_s21 + $0x20] sm:$0xff]   ;;  %v841_v18 = vld [vmem:[#allocation2 + $0x30] sm:$0xff]  ;;  %v2093_v21 = vld [vmem:[%s2896_s21 + $0x18] sm:$0xff]   ;;  %s3016_s22 = scalar_lea.sflag [#allocation5], %s502_s13  ;;  %s2275_s6 = scalar_lea.vmem %s3008_s12, 1024 }
 0x1f5   : > { %1751 = vmatpush3.bf16.msra.mxu0 %v2089_v14  ;;  %v842_v19 = vld [vmem:[#allocation2] sm:$0xff]  ;;  %v2098_v23 = vld [vmem:[%s2904_s4 + $0x30] sm:$0xff]   ;;  %v2095_v25 = vld [vmem:[%s2896_s21 + $0x8] sm:$0xff]   ;;  %p2276_p12 = scmp.ne.s32.totalorder %s3008_s12, %s2275_s6  ;;  %s2487_s14 = smov [#allocation14]  }
 0x1f6   : > { %1752 = vmatprep.subr.bf16.mxu0 %v2090_v15  ;;  %v857_v20 = vpack.c.bf16 %v842_v19, %v841_v18  ;;  %v2097_v22 = vld [vmem:[%s2904_s4 + $0x38] sm:$0xff]   ;;  %v2094_v24 = vld [vmem:[%s2896_s21 + $0x10] sm:$0xff]   ;;  %v2100_v27 = vld [vmem:[%s2904_s4 + $0x20] sm:$0xff]   ;;  %s2279_s27 = sshll.u32 %s2487_s14, 4  ;;  %s2280_s27 = int_to_ptr.vmem [resolvable:$false] %s2279_s27 }
 0x1f7   : > { %1782 = vmatprep.subr.bf16.mxu1 %v2097_v22  ;;  %v2099_v26 = vld [vmem:[%s2904_s4 + $0x28] sm:$0xff]   ;;  %v2096_v28 = vld [vmem:[%s2896_s21] sm:$0xff]   ;;  %v843_v30 = vld [vmem:[#allocation2 + $0x58] sm:$0xff]  ;;  %s3239_s21 = sld [smem:[#allocation42_spill]]  ;;  %s2281_s23 = scalar_lea.vmem %s2280_s27, 2048 }
 0x1f8   : > { %1766 = vmatprep.mubr.bf16.mxu0 %v857_v20  ;;  %1783 = vmatpush3.bf16.msra.mxu1 %v2097_v22  ;;  %v2101_v29 = vld [vmem:[%s2904_s4 + $0x18] sm:$0xff]   ;;  %v845_v32 = vld [vmem:[#allocation2 + $0x50] sm:$0xff]  ;;  %v847_v36 = vld [vmem:[#allocation2 + $0x8] sm:$0xff]  ;;  %p2282_p13 = scmp.lt.s32.totalorder %s3008_s12, %s2280_s27  ;;  %p2283_p1 = scmp.lt.s32.totalorder %s2281_s23, %s2275_s6 }
 0x1f9   : > { %1753 = vmatpush3.bf16.msra.mxu0 %v2090_v15  ;;  %1784 = vmatprep.subr.bf16.mxu1 %v2098_v23  ;;  %v844_v31 = vld [vmem:[#allocation2 + $0x18] sm:$0xff]  ;;  %v846_v33 = vld [vmem:[#allocation2 + $0x68] sm:$0xff]  ;;  %v849_v38 = vld [vmem:[#allocation2 + $0x40] sm:$0xff] }
 0x1fa   : > { %1754 = vmatprep.subr.bf16.mxu0 %v2091_v16  ;;  %v858_v34 = vpack.c.bf16 %v844_v31, %v843_v30  ;;  %v859_v35 = vpack.c.bf16 %v846_v33, %v845_v32  ;;  %v848_v37 = vld [vmem:[#allocation2 + $0x48] sm:$0xff]  ;;  %v850_v39 = vld [vmem:[#allocation2 + $0x20] sm:$0xff]  ;;  %v851_v42 = vld [vmem:[#allocation2 + $0x10] sm:$0xff]  ;;  %p2284_p6 = por %p2283_p1, %p2282_p13 }
 0x1fb   : > { %v860_v40 = vpack.c.bf16 %v848_v37, %v847_v36  ;;  %v861_v41 = vpack.c.bf16 %v850_v39, %v849_v38  ;;  %v852_v43 = vld [vmem:[#allocation2 + $0x38] sm:$0xff]  ;;  %v853_v44 = vld [vmem:[#allocation2 + $0x60] sm:$0xff]  ;;  %v854_v45 = vld [vmem:[#allocation2 + $0x70] sm:$0xff] }
 0x1fc   : > { %1785 = vmatpush3.bf16.msra.mxu1 %v2098_v23  ;;  %v862_v46 = vpack.c.bf16 %v852_v43, %v851_v42  ;;  %v863_v47 = vpack.c.bf16 %v854_v45, %v853_v44  ;;  %v855_v48 = vld [vmem:[#allocation2 + $0x78] sm:$0xff]  ;;  %v856_v49 = vld [vmem:[#allocation2 + $0x28] sm:$0xff]  ;;  %v1611_v56 = vld [vmem:[%s443_s7] ss:$0 sm:$0xff] }
 0x1fd   : > { %1755 = vmatpush3.bf16.msra.mxu0 %v2091_v16  ;;  %1786 = vmatprep.subr.bf16.mxu1 %v2099_v26  ;;  %v864_v50 = vpack.c.bf16 %v856_v49, %v855_v48  ;;  %v2102_v51 = vld [vmem:[%s2904_s4 + $0x10] sm:$0xff]   ;;  %v2103_v52 = vld [vmem:[%s2904_s4 + $0x8] sm:$0xff]   ;;  %v2104_v53 = vld [vmem:[%s2904_s4] sm:$0xff]   ;;  %s3240_s4 = sld [smem:[#allocation52_spill]]  ;;  %p3241_p10 = scmp.ne.s32.totalorder %s3239_s21, 0 }
 0x1fe   : > { %1756 = vmatprep.subr.bf16.mxu0 %v2092_v17  ;;  %v2106_v48 = vld [vmem:[%s2886_s10 + $0x10] sm:$0xff]  }
 0x1ff   : > { %p2277_p2 = pnand %p2276_p12, %p3241_p10 }
 0x200   : > { %1787 = vmatpush3.bf16.msra.mxu1 %v2099_v26 }
 0x201   : > { %1757 = vmatpush3.bf16.msra.mxu0 %v2092_v17  ;;  %1788 = vmatprep.subr.bf16.mxu1 %v2100_v27  ;;  %p2278_p9 = pneg %p2277_p2 }
 0x202   : > { %1758 = vmatprep.subr.bf16.mxu0 %v2093_v21 }
 0x203   : > { %p2285_p4 = pnand %p2284_p6, %p2278_p9 }
 0x204   : > { %1789 = vmatpush3.bf16.msra.mxu1 %v2100_v27 }
 0x205   : > { %1759 = vmatpush3.bf16.msra.mxu0 %v2093_v21  ;;  %1790 = vmatprep.subr.bf16.mxu1 %v2101_v29 }
 0x206   : > { %1760 = vmatprep.subr.bf16.mxu0 %v2094_v24 }
 0x208   : > { %1791 = vmatpush3.bf16.msra.mxu1 %v2101_v29 }
 0x209   : > { %1761 = vmatpush3.bf16.msra.mxu0 %v2094_v24  ;;  %1792 = vmatprep.subr.bf16.mxu1 %v2102_v51 }
 0x20a   : > { %1762 = vmatprep.subr.bf16.mxu0 %v2095_v25 }
 0x20c   : > { %1793 = vmatpush3.bf16.msra.mxu1 %v2102_v51 }
 0x20d   : > { %1763 = vmatpush3.bf16.msra.mxu0 %v2095_v25  ;;  %1794 = vmatprep.subr.bf16.mxu1 %v2103_v52 }
 0x20e   : > { %1764 = vmatprep.subr.bf16.mxu0 %v2096_v28 }
 0x210   : > { %1795 = vmatpush3.bf16.msra.mxu1 %v2103_v52 }
 0x211   : > { %1765 = vmatpush3.bf16.msra.mxu0 %v2096_v28  ;;  %1796 = vmatprep.subr.bf16.mxu1 %v2104_v53 }
 0x214   : > { %1767 = vmatmul.mubr.bf16.vlgmr.msra.gmra.mxu0 %v858_v34  ;;  %1797 = vmatpush3.bf16.msra.mxu1 %v2104_v53 }
 0x215   : > { %1770 = vmatprep.mubr.bf16.mxu0 %v859_v35 }
 0x21c   : > { %1771 = vmatmul.mubr.bf16.gmra.mxu0 %v860_v40 }
 0x21d   : > { %1774 = vmatprep.mubr.bf16.mxu0 %v861_v41 }
 0x224   : > { %1775 = vmatmul.mubr.bf16.gmra.mxu0 %v862_v46 }
 0x225   : > { %1778 = vmatprep.mubr.bf16.mxu0 %v863_v47  ;;  %v2105_v47 = vld [vmem:[%s2886_s10] sm:$0xff]  }
 0x22c   : > { %1779 = vmatmul.mubr.bf16.gmra.mxu0 %v864_v50 }
 0x22d   : > { %1830 = vmatprep.mubr.bf16.mxu0 %v2105_v47 }
 0x2d4   : > { %v1768_v54 = vpop.f32.mrf.mxu0 }
 0x2d5   : > { %v979_v60 = vadd.f32 %v1768_v54, %v1611_v56 }
 0x2d6   : > { %v970_v55 = vpop.f32.mrf.mxu0 }
 0x2d7   : > { %v971_v58 = vadd.f32 %v1611_v56, %v970_v55  ;;  %v1035_v3 = vmax.f32 %v979_v60, 0.0 }
 0x2d8   : > { %v1769_v57 = vpop.f32.mrf.mxu0 }
 0x2d9   : > { %v982_v59 = vadd.f32 %v1769_v57, %v1611_v56  ;;  %v1033_v1 = vmax.f32 %v971_v58, 0.0 }
 0x2da   : > { %v973_v61 = vpop.f32.mrf.mxu0 }
 0x2db   : > { %v974_v62 = vadd.f32 %v1611_v56, %v973_v61  ;;  %v1036_v63 = vmax.f32 %v982_v59, 0.0 }
 0x2dc   : > { %v1772_v0 = vpop.f32.mrf.mxu0 }
 0x2dd   : > { %v1034_v2 = vmax.f32 %v974_v62, 0.0  ;;  %v1050_v6 = vpack.c.bf16 %v1036_v63, %v1035_v3  ;;  %v995_v10 = vadd.f32 %v1772_v0, %v1611_v56 }
 0x2de   : > { %v986_v4 = vpop.f32.mrf.mxu0 }
 0x2df   : > { %v1049_v5 = vpack.c.bf16 %v1034_v2, %v1033_v1  ;;  %v987_v8 = vadd.f32 %v1611_v56, %v986_v4  ;;  %v1039_v17 = vmax.f32 %v995_v10, 0.0  ;;  %v2108_v10 = vld [vmem:[%s2886_s10 + $0x18] sm:$0xff]  }
 0x2e0   : > { %v1773_v7 = vpop.f32.mrf.mxu0 }
 0x2e1   : > { %v998_v9 = vadd.f32 %v1773_v7, %v1611_v56  ;;  %1798 = vmatprep.mubr.bf16.mxu1 %v1049_v5  ;;  %v1037_v15 = vmax.f32 %v987_v8, 0.0 }
 0x2e2   : > { %v989_v11 = vpop.f32.mrf.mxu0  ;;  %1799 = vmatmul.mubr.bf16.vlgmr.msra.gmra.mxu1 %v1050_v6 }
 0x2e3   : > { %v990_v12 = vadd.f32 %v1611_v56, %v989_v11  ;;  %v1040_v13 = vmax.f32 %v998_v9, 0.0  ;;  %v2107_v9 = vld [vmem:[%s2886_s10 + $0x8] sm:$0xff]   ;;  %v1220_v11 = vld [vmem:[%s2923_s28 + $0x10] sm:$0xff]  ;;  %s1638_s10 = sshll.u32 %s3237_s15, 10 }
 0x2e4   : > { %v1776_v14 = vpop.f32.mrf.mxu0  ;;  %s3006_s24 = scalar_lea.hbm %s3240_s4, %s1638_s10 }
 0x2e5   : > { %v1038_v16 = vmax.f32 %v990_v12, 0.0  ;;  %v1052_v20 = vpack.c.bf16 %v1040_v13, %v1039_v17  ;;  %v1011_v24 = vadd.f32 %v1776_v14, %v1611_v56  ;;  %v1224_v12 = vld [vmem:[%s2923_s28 + $0x30] sm:$0xff] }
 0x2e6   : > { %v1002_v18 = vpop.f32.mrf.mxu0 }
 0x2e7   : > { %v1051_v19 = vpack.c.bf16 %v1038_v16, %v1037_v15  ;;  %v1003_v22 = vadd.f32 %v1611_v56, %v1002_v18  ;;  %v1043_v31 = vmax.f32 %v1011_v24, 0.0  ;;  %v1218_v15 = vld [vmem:[%s2923_s28] sm:$0xff] }
 0x2e8   : > { %v1777_v21 = vpop.f32.mrf.mxu0  ;;  %v1222_v16 = vld [vmem:[%s2923_s28 + $0x20] sm:$0xff] }
 0x2e9   : > { %v1014_v23 = vadd.f32 %v1777_v21, %v1611_v56  ;;  %1802 = vmatprep.mubr.bf16.mxu1 %v1051_v19  ;;  %v1041_v29 = vmax.f32 %v1003_v22, 0.0  ;;  %v1221_v21 = vld [vmem:[%s2923_s28 + $0x18] sm:$0xff] }
 0x2ea   : > { %v1005_v25 = vpop.f32.mrf.mxu0  ;;  %1803 = vmatmul.mubr.bf16.gmra.mxu1 %v1052_v20  ;;  %v1225_v22 = vld [vmem:[%s2923_s28 + $0x38] sm:$0xff] }
 0x2eb   : > { %v1006_v26 = vadd.f32 %v1611_v56, %v1005_v25  ;;  %v1044_v27 = vmax.f32 %v1014_v23, 0.0 }
 0x2ec   : > { %v1780_v28 = vpop.f32.mrf.mxu0 }
 0x2ed   : > { %v1042_v30 = vmax.f32 %v1006_v26, 0.0  ;;  %v1054_v34 = vpack.c.bf16 %v1044_v27, %v1043_v31  ;;  %v1027_v38 = vadd.f32 %v1780_v28, %v1611_v56  ;;  %v1219_v27 = vld [vmem:[%s2923_s28 + $0x8] sm:$0xff] }
 0x2ee   : > { %v1018_v32 = vpop.f32.mrf.mxu0  ;;  %v1223_v28 = vld [vmem:[%s2923_s28 + $0x28] sm:$0xff] }
 0x2ef   : > { %v1053_v33 = vpack.c.bf16 %v1042_v30, %v1041_v29  ;;  %v1019_v36 = vadd.f32 %v1611_v56, %v1018_v32  ;;  %v1047_v44 = vmax.f32 %v1027_v38, 0.0 }
 0x2f0   : > { %v1781_v35 = vpop.f32.mrf.mxu0 }
 0x2f1   : > { %v1030_v37 = vadd.f32 %v1781_v35, %v1611_v56  ;;  %1806 = vmatprep.mubr.bf16.mxu1 %v1053_v33  ;;  %v1045_v42 = vmax.f32 %v1019_v36, 0.0 }
 0x2f2   : > { %v1021_v39 = vpop.f32.mrf.mxu0  ;;  %1807 = vmatmul.mubr.bf16.gmra.mxu1 %v1054_v34 }
 0x2f3   : > { %v1022_v40 = vadd.f32 %v1611_v56, %v1021_v39  ;;  %v1048_v41 = vmax.f32 %v1030_v37, 0.0 }
 0x2f5   : > { %v1046_v43 = vmax.f32 %v1022_v40, 0.0  ;;  %v1056_v46 = vpack.c.bf16 %v1048_v41, %v1047_v44 }
 0x2f7   : > { %v1055_v45 = vpack.c.bf16 %v1046_v43, %v1045_v42 }
 0x2f9   : > { %1810 = vmatprep.mubr.bf16.mxu1 %v1055_v45 }
 0x2fa   : > { %1811 = vmatmul.mubr.bf16.gmra.mxu1 %v1056_v46 }
 0x2fb   : > { %1834 = vmatprep.mubr.bf16.mxu1 %v2106_v48 }
 0x3a2   : > { %v1800_v49 = vpop.f32.mrf.mxu1 }
 0x3a4   : > { %v1155_v50 = vpop.f32.mrf.mxu1 }
 0x3a6   : > { %v1801_v51 = vpop.f32.mrf.mxu1 }
 0x3a7   : > { %v1235_v7 = vpack.c.bf16 %v1801_v51, %v1800_v49 }
 0x3a8   : > { %v1158_v52 = vpop.f32.mrf.mxu1 }
 0x3a9   : > { %v1234_v8 = vpack.c.bf16 %v1158_v52, %v1155_v50 }
 0x3aa   : > { %v1804_v53 = vpop.f32.mrf.mxu1 }
 0x3ac   : > { %v1171_v54 = vpop.f32.mrf.mxu1 }
 0x3ae   : > { %v1805_v55 = vpop.f32.mrf.mxu1 }
 0x3af   : > { %v1237_v5 = vpack.c.bf16 %v1805_v55, %v1804_v53 }
 0x3b0   : > { %v1174_v56 = vpop.f32.mrf.mxu1 }
 0x3b1   : > { %v1236_v6 = vpack.c.bf16 %v1174_v56, %v1171_v54 }
 0x3b2   : > { %v1808_v57 = vpop.f32.mrf.mxu1 }
 0x3b4   : > { %v1187_v58 = vpop.f32.mrf.mxu1 }
 0x3b6   : > { %v1809_v59 = vpop.f32.mrf.mxu1 }
 0x3b7   : > { %v1239_v3 = vpack.c.bf16 %v1809_v59, %v1808_v57 }
 0x3b8   : > { %v1190_v60 = vpop.f32.mrf.mxu1 }
 0x3b9   : > { %v1238_v4 = vpack.c.bf16 %v1190_v60, %v1187_v58 }
 0x3ba   : > { %v1812_v61 = vpop.f32.mrf.mxu1 }
 0x3bc   : > { %v1203_v62 = vpop.f32.mrf.mxu1 }
 0x3be   : > { %v1813_v63 = vpop.f32.mrf.mxu1 }
 0x3bf   : > { %v1241_v0 = vpack.c.bf16 %v1813_v63, %v1812_v61 }
 0x3c0   : > { %v1206_v1 = vpop.f32.mrf.mxu1 }
 0x3c1   : > { %v1240_v2 = vpack.c.bf16 %v1206_v1, %v1203_v62  ;;  %1814 = vmatprep.subr.bf16.mxu0 %v1241_v0  ;;  %1854 = vmatprep.subr.bf16.mxu1 %v1241_v0 }
 0x3c2   : > { %1815 = vmatpush3.bf16.msra.mxu0 %v1241_v0  ;;  %1862 = vmatpush3.bf16.msra.mxu1 %v1241_v0 }
 0x3c3   : > { %1816 = vmatprep.subr.bf16.mxu0 %v1240_v2  ;;  %1855 = vmatprep.subr.bf16.mxu1 %v1240_v2 }
 0x3c6   : > { %1817 = vmatpush3.bf16.msra.mxu0 %v1240_v2  ;;  %1863 = vmatpush3.bf16.msra.mxu1 %v1240_v2 }
 0x3c7   : > { %1818 = vmatprep.subr.bf16.mxu0 %v1239_v3  ;;  %1856 = vmatprep.subr.bf16.mxu1 %v1239_v3 }
 0x3ca   : > { %1819 = vmatpush3.bf16.msra.mxu0 %v1239_v3  ;;  %1864 = vmatpush3.bf16.msra.mxu1 %v1239_v3 }
 0x3cb   : > { %1820 = vmatprep.subr.bf16.mxu0 %v1238_v4  ;;  %1857 = vmatprep.subr.bf16.mxu1 %v1238_v4 }
 0x3ce   : > { %1821 = vmatpush3.bf16.msra.mxu0 %v1238_v4  ;;  %1865 = vmatpush3.bf16.msra.mxu1 %v1238_v4 }
 0x3cf   : > { %1822 = vmatprep.subr.bf16.mxu0 %v1237_v5  ;;  %1858 = vmatprep.subr.bf16.mxu1 %v1237_v5 }
 0x3d2   : > { %1823 = vmatpush3.bf16.msra.mxu0 %v1237_v5  ;;  %1866 = vmatpush3.bf16.msra.mxu1 %v1237_v5 }
 0x3d3   : > { %1824 = vmatprep.subr.bf16.mxu0 %v1236_v6  ;;  %1859 = vmatprep.subr.bf16.mxu1 %v1236_v6 }
 0x3d6   : > { %1825 = vmatpush3.bf16.msra.mxu0 %v1236_v6  ;;  %1867 = vmatpush3.bf16.msra.mxu1 %v1236_v6 }
 0x3d7   : > { %1826 = vmatprep.subr.bf16.mxu0 %v1235_v7  ;;  %1860 = vmatprep.subr.bf16.mxu1 %v1235_v7 }
 0x3da   : > { %1827 = vmatpush3.bf16.msra.mxu0 %v1235_v7  ;;  %1868 = vmatpush3.bf16.msra.mxu1 %v1235_v7 }
 0x3db   : > { %1828 = vmatprep.subr.bf16.mxu0 %v1234_v8  ;;  %1861 = vmatprep.subr.bf16.mxu1 %v1234_v8 }
 0x3de   : > { %1829 = vmatpush3.bf16.msra.mxu0 %v1234_v8  ;;  %1869 = vmatpush3.bf16.msra.mxu1 %v1234_v8 }
 0x3e1   : > { %1831 = vmatmul.mubr.bf16.vlgmr.msra.gmra.mxu0 %v2107_v9  ;;  %1835 = vmatmul.mubr.bf16.vlgmr.msra.gmra.mxu1 %v2108_v10 }
 0x4a1   : > { %v1832_v13 = vpop.f32.mrf.mxu0  ;;  %v1836_v14 = vpop.f32.mrf.mxu1 }
 0x4a2   : > { %v1333_v17 = vadd.f32 %v1832_v13, %v1220_v11  ;;  %v1337_v18 = vadd.f32 %v1836_v14, %v1224_v12 }
 0x4a3   : > { %v1300_v19 = vpop.f32.mrf.mxu0  ;;  %v1316_v20 = vpop.f32.mrf.mxu1 }
 0x4a4   : > { %1341 = vst [vmem:[%s2923_s28 + $0x10] sm:$0xff] %v1333_v17  ;;  %1345 = vst [vmem:[%s2923_s28 + $0x30] sm:$0xff] %v1337_v18  ;;  %v1331_v23 = vadd.f32 %v1300_v19, %v1218_v15  ;;  %v1335_v24 = vadd.f32 %v1316_v20, %v1222_v16 }
 0x4a5   : > { %v1833_v25 = vpop.f32.mrf.mxu0  ;;  %v1837_v26 = vpop.f32.mrf.mxu1 }
 0x4a6   : > { %1339 = vst [vmem:[%s2923_s28] sm:$0xff] %v1331_v23  ;;  %1343 = vst [vmem:[%s2923_s28 + $0x20] sm:$0xff] %v1335_v24  ;;  %v1334_v29 = vadd.f32 %v1833_v25, %v1221_v21  ;;  %v1338_v30 = vadd.f32 %v1837_v26, %v1225_v22 }
 0x4a7   : > { %v1303_v31 = vpop.f32.mrf.mxu0  ;;  %v1319_v32 = vpop.f32.mrf.mxu1 }
 0x4a8   : > { %1342 = vst [vmem:[%s2923_s28 + $0x18] sm:$0xff] %v1334_v29  ;;  %1346 = vst [vmem:[%s2923_s28 + $0x38] sm:$0xff] %v1338_v30  ;;  %v1332_v33 = vadd.f32 %v1303_v31, %v1219_v27  ;;  %v1336_v34 = vadd.f32 %v1319_v32, %v1223_v28 }
 0x4aa   : > { %1340 = vst [vmem:[%s2923_s28 + $0x8] sm:$0xff] %v1332_v33  ;;  %1344 = vst [vmem:[%s2923_s28 + $0x28] sm:$0xff] %v1336_v34 }
 0x4ab   : > { %2288 = shalt.err (!%p2285_p4)
}
 0x4ac   : > { %s2289_s13 = scalar_lea.hbm %s3006_s24, 1024  ;;  %s2293_s28 = scalar_lea.hbm %s3240_s4, 2048 }
 0x4ad   : > { %p2290_p5 = scmp.ne.s32.totalorder %s3006_s24, %s2289_s13  ;;  %p2294_p3 = scmp.lt.s32.totalorder %s3006_s24, %s3240_s4 }
 0x4ae   : > { %p2295_p0 = scmp.lt.s32.totalorder %s2293_s28, %s2289_s13 }
 0x4af   : > { %p2291_p8 = pnand %p2290_p5, %p3241_p10 }
 0x4b0   : > { %p2296_p7 = por %p2295_p0, %p2294_p3 }
 0x4b1   : > { %p2292_p11 = pneg %p2291_p8 }
 0x4b3   : > { %p2297_p12 = pnand %p2296_p7, %p2292_p11 }
 0x4b5   : > { %2300 = shalt.err (!%p2297_p12)
}
 0x4b6   : > { %s2488_s3 = smov 128   ;;  %s2489_s20 = smov 8  }
 0x4b7   : > { %1884 = dma.vmem_to_hbm [thread:$0]  (%p3241_p10), %s3008_s12, 1024, %s3006_s24, %s3016_s22, %s2488_s3, %s2488_s3, %s2489_s20  }
 0x4b8 PF: > { %s3242_s15 = sld [smem:[#allocation21_spill]]  ;;  %p1913_p2 = scmp.ge.s32.totalorder %s2475_s19, 2 }
 0x4b9   : > { %s3243_s10 = sld [smem:[#allocation43_spill]] }
 0x4be   : > { %s1376_s1 = sand.u32 1, %s3242_s15  }
 0x4bf   : > { %p3244_p9 = scmp.ne.s32.totalorder %s3243_s10, 0  ;;  %s1377_s7 = scalar_lea.sflag [#allocation5], %s1376_s1 }
 0x4c1   : > { %p1907_p13 = pnand %p1913_p2, %p3244_p9 }
 0x4c3   : > { %p1908_p1 = pneg %p1907_p13 }
 0x4c5   : > { %2398 = dma.done.wait (%p1908_p1), %s1377_s7, 1024  }
 0x4c6   : > { %2400 = vsyncadd (%p1908_p1), %s1377_s7, 4294966272  ;;  %s30_s19 = sadd.s32 1, %s2475_s19   ;;  %s3246_s24 = sld [smem:[#allocation22_spill]] }
 0x4c7   : > { %p3044_p6 = scmp.ge.s32.totalorder %s30_s19, 18   ;;  %s3247_s12 = smov %s2818_s25 }
 0x4c8   : > { %s3248_s27 = sld [smem:[#allocation23_spill]]  ;;  %s3257_s25 = smov %s2411_s26 }
 0x4c9   : > { %s3249_s28 = sld [smem:[#allocation24_spill]]  ;;  %s3258_s2 = smov %s3277_s29 }
 0x4ca   : > { %s3250_s21 = sld [smem:[#allocation37_spill]]  ;;  %s3259_s26 = smov %s3247_s12 }
 0x4cb   : > { %s3251_s30 = sld [smem:[#allocation26_spill]]  ;;  %s3261_s8 = smov %s2435_s9 }
 0x4cc   : > { %s3252_s10 = sld [smem:[#allocation27_spill]]  ;;  %s3262_s9 = smov %s2821_s5 }
 0x4cd   : > { %s3253_s11 = sld [smem:[#allocation28_spill]]  ;;  %s3264_s13 = smov %s2463_s16 }
 0x4ce   : > { %s3254_s22 = sld [smem:[#allocation36_spill]]  ;;  %s3265_s14 = smov %s2467_s17 }
 0x4cf   : > { %s3255_s6 = sld [smem:[#allocation32_spill]]  ;;  %s3266_s15 = smov %s2471_s18 }
 0x4d0   : > { %s3256_s23 = sld [smem:[#allocation34_spill]]  ;;  %s3260_s29 = smov %s3250_s21 }
 0x4d1   : > { %s3269_s18 = smov %s3258_s2 }
 0x4d2   :  { %29 = sbr.rel (!%p3044_p6) target bundleno = 27 (0x1b), region = 157 }
 0x4d4   : > { %s3263_s12 = smov %s3254_s22 }
 0x4d5   : > { %s3267_s16 = smov %s3255_s6 }
 0x4d6   : > { %s3268_s17 = smov %s3256_s23 }
 0x4d7   :  { %1382 = vsyncpa [#allocation4], 1 }
 0x4d8   :  { %1384 = vsyncpa [#allocation4 + $0x1], 1 }
 0x4d9   :  { %1385 = vsyncpa [#allocation7], 1 }
 0x4da   :  { %1387 = vsyncpa [#allocation7 + $0x1], 1 }
 0x4db   :  { %1388 = vsyncpa [#allocation10], 1 }
 0x4dc   :  { %1390 = vsyncpa [#allocation10 + $0x1], 1 }
 0x4dd   :  { %1391 = vsyncpa [#allocation13], 1 }
 0x4de   :  { %1393 = vsyncpa [#allocation13 + $0x1], 1 }
 0x4df   :  { %1394 = vsyncpa [#allocation5], 1 }
 0x4e0   :  { %1396 = vsyncpa [#allocation5 + $0x1], 1 }

</bundles_post_ra>
